<compile_context>
chip_gen: v6e
topology: v6e:2x2x1
jax: 0.10.0
libtpu: 0.0.40
codegen_flags: <defaults>
</compile_context>

<pallas_src>
import functools

import numpy as np
import jax
import jax.numpy as jnp
from jax import lax
from jax.experimental import pallas as pl
from jax.experimental.pallas import tpu as pltpu

C_LIGHT = 299792458.0


def _round_up(a, b):
    return ((a + b - 1) // b) * b


# ----------------------------------------------------------------------------
# Parameter / kernel construction (host-side glue, mirrors LDBP.__init__ math)
# ----------------------------------------------------------------------------
def get_beta2(D, Fc):
    """D [ps/nm/km], Fc [Hz] -> beta2 [s^2/km]."""
    c_kms = C_LIGHT / 1000.0
    lamb = c_kms / Fc
    return -(D * lamb ** 2) / (2 * np.pi * c_kms)


def prepare_ldbp_params(task_info, DBP_info, nl_param):
    """Per-batch dispersion kernel, nonlinear kernel and phase scale."""
    steps = DBP_info['step']
    dz = DBP_info['L'] / steps
    D, Fc = DBP_info['D'], DBP_info['Fc']
    dtaps, ntaps = DBP_info['dtaps'], DBP_info['ntaps']
    Nmodes = DBP_info['Nmodes']

    ti = np.asarray(task_info, dtype=np.float64)
    B = ti.shape[0]

    beta2_km = get_beta2(D, Fc)                                  # s^2/km
    beta2 = beta2_km / 1000.0                                    # s^2/m
    beta1 = 2.0 * np.pi * (ti[:, 1] - Fc) * beta2_km / 1000.0    # [B], s/m
    Fs = ti[:, 2]                                                # [B], Hz

    # time-domain dispersion kernel for distance -dz
    omega = 2.0 * np.pi * Fs[:, None] * np.fft.fftfreq(dtaps)[None, :]
    kern_f = np.exp(-1j * beta1[:, None] * omega * (-dz)
                    - 1j * (beta2 / 2.0) * omega ** 2 * (-dz))
    Dk = np.fft.fftshift(np.fft.ifft(kern_f, axis=-1), axes=-1).astype(np.complex64)

    # FDBP: the nonlinear filter is a single learned Parameter broadcast to batch.
    nl = np.asarray(nl_param, dtype=np.float32)
    Nk = np.array(np.broadcast_to(nl[None, :], (B, nl.shape[0])))
    Nk = Nk.reshape(B, Nmodes, Nmodes, ntaps)                    # [B, i, j, taps]

    P = 0.001 * 10.0 ** (ti[:, 0] / 10.0) / Nmodes               # [B], Watts
    scale = (DBP_info['gamma'] * dz * P).astype(np.float32)      # gamma*P*dz, [B]
    return jnp.asarray(Dk), jnp.asarray(Nk), jnp.asarray(scale)


# ----------------------------------------------------------------------------
# Fused Pallas kernel: all DBP steps for one (batch group, output lane tile).
# ----------------------------------------------------------------------------
def _ldbp_tile_kernel(x_ref, dk_ref, nkw_ref, y_ref, *,
                      steps, dtaps, ntaps, nmodes, bblk, tile, width):
    rows = nmodes * bblk          # == 8 (real rows; imag rows follow)
    off = (ntaps - 1) // 2
    W = width                     # fixed, lane-aligned working width

    def shift_left(a, k):
        # a'[:, j] = a[:, j + k]  (cyclic roll; wrapped tail lanes are don't-care)
        if k == 0:
            return a
        return pltpu.roll(a, W - k, axis=1)

    t = pl.program_id(1)
    start = pl.multiple_of(t * tile, 128)

    xin = x_ref[:, pl.ds(start, W)]                 # [2*rows, W]
    xr = xin[0:rows, :]
    xi = xin[rows:2 * rows, :]

    # per-tap [rows, 1] columns, hoisted out of the step loop
    dk = dk_ref[...]                                # [2*rows, dtaps]
    nkw = nkw_ref[...]                              # [2*rows, ntaps]
    dkr = [dk[0:rows, k:k + 1] for k in range(dtaps)]
    dki = [dk[rows:2 * rows, k:k + 1] for k in range(dtaps)]
    wsm = [nkw[0:rows, k:k + 1] for k in range(ntaps)]           # Nk[b,m,m,:]*scale
    wxc = [nkw[rows:2 * rows, k:k + 1] for k in range(ntaps)]    # Nk[b,1-m,m,:]*scale

    def step(carry):
        ar, ai = carry                              # [rows, W] real / imag

        # --- dispersion: complex valid correlation, left-anchored -----------
        ur = ar * dkr[0] - ai * dki[0]
        ui = ar * dki[0] + ai * dkr[0]
        for k in range(1, dtaps):
            ar_k = shift_left(ar, k)
            ai_k = shift_left(ai, k)
            ur = ur + ar_k * dkr[k] - ai_k * dki[k]
            ui = ui + ar_k * dki[k] + ai_k * dkr[k]

        # --- nonlinear phase: |u|^2 correlated with mode-mixing taps --------
        p = ur * ur + ui * ui
        phi = p * wsm[0]
        if nmodes == 2:
            phx = p * wxc[0]
        for k in range(1, ntaps):
            p_k = shift_left(p, k)
            phi = phi + p_k * wsm[k]
            if nmodes == 2:
                phx = phx + p_k * wxc[k]
        if nmodes == 2:
            # deliver each row's cross-accumulation to the *other* polarization:
            # a single XLU sublane roll instead of a concatenate copy.
            phi = phi + pltpu.roll(phx, bblk, axis=0)

        # --- crop u to the phi window and apply the nonlinear phase rotation
        ucr = shift_left(ur, off)
        uci = shift_left(ui, off)
        c = jnp.cos(phi)
        s = jnp.sin(phi)
        return ucr * c - uci * s, ucr * s + uci * c

    if steps <= 4:
        for _ in range(steps):                      # short loops: full unroll
            xr, xi = step((xr, xi))
    else:                                           # bound trace size otherwise
        xr, xi = lax.fori_loop(0, steps, lambda _, cr: step(cr), (xr, xi))

    # lane-dense, unmasked store of the first `tile` (valid) lanes
    y_ref[0:rows, :] = xr[:, 0:tile]
    y_ref[rows:2 * rows, :] = xi[:, 0:tile]


# ----------------------------------------------------------------------------
# Full LDBP forward (FDBP variant)
# ----------------------------------------------------------------------------
def ldbp_forward(x, task_info, DBP_info, nl_param, *, tile_lanes=512):
    """x: [B, L, Nmodes] complex64 -> [B, L - steps*(dtaps-1+ntaps-1), Nmodes]."""
    Dk, Nk, scale = prepare_ldbp_params(task_info, DBP_info, nl_param)
    B, L, Nmodes = x.shape
    dtaps, ntaps, steps = DBP_info['dtaps'], DBP_info['ntaps'], DBP_info['step']
    assert dtaps % 2 == 1 and ntaps % 2 == 1
    assert Nmodes in (1, 2)
    halo = steps * (dtaps - 1 + ntaps - 1)
    lout = L - halo
    assert lout > 0

    # batch padding so every group fills all 8 f32 sublanes (rows == 8).
    bblk = 8 // Nmodes
    Bp = _round_up(B, bblk)
    G = Bp // bblk
    rows = bblk * Nmodes                           # always 8

    # overlap-save lane tiling
    lout_pad = _round_up(lout, 128)
    tile = 128
    for cand in (tile_lanes, 512, 384, 256):
        if cand % 128 == 0 and 0 < cand <= lout_pad and lout_pad % cand == 0:
            tile = cand
            break
    num_tiles = lout_pad // tile
    hp = _round_up(halo, 128) if halo > 0 else 0   # lane-aligned halo
    width = tile + hp                              # fixed in-kernel working width
    lpad = lout_pad + hp                           # >= L, covers the last tile read

    if Bp != B:
        pad_b = Bp - B
        x = jnp.pad(x, ((0, pad_b), (0, 0), (0, 0)))
        Dk = jnp.pad(Dk, ((0, pad_b), (0, 0)))
        Nk = jnp.pad(Nk, ((0, pad_b), (0, 0), (0, 0), (0, 0)))
        scale = jnp.pad(scale, ((0, pad_b),))

    # signal planes [G, 2*rows, lpad]; row = mode*bblk + local_batch,
    # real rows first, imaginary rows second.
    def to_rows(a):                                # [Bp, L, Nmodes] -> [G, rows, L]
        a = jnp.transpose(a, (2, 0, 1))            # [Nmodes, Bp, L]
        a = a.reshape(Nmodes, G, bblk, L)
        return jnp.transpose(a, (1, 0, 2, 3)).reshape(G, rows, L)

    xr = to_rows(jnp.real(x).astype(jnp.float32))
    xi = to_rows(jnp.imag(x).astype(jnp.float32))
    x_ri = jnp.concatenate([xr, xi], axis=1)                     # [G, 2*rows, L]
    x_ri = jnp.pad(x_ri, ((0, 0), (0, 0), (0, lpad - L)))

    # dispersion taps per row: [G, 2*rows, dtaps]
    def taps_to_rows(tp):                          # [Bp, dtaps] -> [G, rows, dtaps]
        tp = tp.reshape(G, bblk, dtaps)
        tp = jnp.broadcast_to(tp[:, None], (G, Nmodes, bblk, dtaps))
        return tp.reshape(G, rows, dtaps)

    dk_ri = jnp.concatenate(
        [taps_to_rows(jnp.real(Dk).astype(jnp.float32)),
         taps_to_rows(jnp.imag(Dk).astype(jnp.float32))], axis=1)

    # nonlinear taps with gamma*P*dz folded in: [G, 2*rows, ntaps]
    #   first `rows`: same-mode taps     Nk[b, m, m, :]
    #   next  `rows`: cross taps stored "as seen by the other mode":
    #                 row-mode m holds Nk[b, 1-m, m, :]; the kernel sublane-rolls
    #                 the cross accumulation by bblk to deliver it to mode 1-m.
    wN = scale[:, None, None, None] * Nk                         # [Bp, i, j, ntaps]

    def nl_to_rows(sel_i, sel_j):
        wb = jnp.stack([wN[:, sel_i(m), sel_j(m), :] for m in range(Nmodes)], axis=1)
        wb = wb.reshape(G, bblk, Nmodes, ntaps)
        return jnp.transpose(wb, (0, 2, 1, 3)).reshape(G, rows, ntaps)

    nkw = jnp.concatenate(
        [nl_to_rows(lambda m: m, lambda m: m),
         nl_to_rows(lambda m: (m + 1) % Nmodes, lambda m: m)],
        axis=1).astype(jnp.float32)

    kernel = functools.partial(
        _ldbp_tile_kernel, steps=steps, dtaps=dtaps, ntaps=ntaps,
        nmodes=Nmodes, bblk=bblk, tile=tile, width=width)

    y_ri = pl.pallas_call(
        kernel,
        out_shape=jax.ShapeDtypeStruct((G, 2 * rows, lout_pad), jnp.float32),
        grid_spec=pltpu.PrefetchScalarGridSpec(
            num_scalar_prefetch=0,
            grid=(G, num_tiles),
            in_specs=[
                # whole-L block per group (same block index across t -> DMA'd once)
                pl.BlockSpec((None, 2 * rows, lpad), lambda g, t: (g, 0, 0)),
                pl.BlockSpec((None, 2 * rows, dtaps), lambda g, t: (g, 0, 0)),
                pl.BlockSpec((None, 2 * rows, ntaps), lambda g, t: (g, 0, 0)),
            ],
            out_specs=pl.BlockSpec((None, 2 * rows, tile),
                                   lambda g, t: (g, 0, t)),
        ),
        compiler_params=pltpu.CompilerParams(
            dimension_semantics=("parallel", "parallel"),
        ),
    )(x_ri, dk_ri, nkw)

    # unpack: [G, 2*rows, lout_pad] -> [B, lout, Nmodes] complex64
    def from_rows(a):                              # [G, rows, lout] -> [Bp, lout, Nmodes]
        a = a.reshape(G, Nmodes, bblk, lout)
        return jnp.transpose(a, (0, 2, 3, 1)).reshape(Bp, lout, Nmodes)

    yr = from_rows(y_ri[:, :rows, :lout])
    yi = from_rows(y_ri[:, rows:, :lout])
    return (yr + 1j * yi)[:B].astype(jnp.complex64)


# ----------------------------------------------------------------------------
# Pure-JAX reference (gather-based convs) for a correctness check
# ----------------------------------------------------------------------------
def ldbp_reference(x, task_info, DBP_info, nl_param):
    Dk, Nk, scale = prepare_ldbp_params(task_info, DBP_info, nl_param)
    dtaps, ntaps, steps = DBP_info['dtaps'], DBP_info['ntaps'], DBP_info['step']
    B, _, Nmodes = x.shape
    off = (ntaps - 1) // 2

    def valid_corr(sig, ker):
        K = ker.shape[0]
        n = sig.shape[0] - K + 1
        idx = jnp.arange(n)[:, None] + jnp.arange(K)[None, :]
        return (sig[idx] * ker[None, :]).sum(-1)

    for _ in range(steps):
        u = jnp.stack([jnp.stack([valid_corr(x[b, :, m], Dk[b])
                                  for m in range(Nmodes)], axis=-1)
                       for b in range(B)], axis=0)                    # [B, L1, Nmodes]
        p = jnp.abs(u) ** 2
        phi = jnp.stack([jnp.stack([sum(valid_corr(p[b, :, j], Nk[b, i, j])
                                        for j in range(Nmodes))
                                    for i in range(Nmodes)], axis=-1)
                         for b in range(B)], axis=0)                  # [B, L2, Nmodes]
        L2 = phi.shape[1]
        uc = u[:, off:off + L2, :]
        x = uc * jnp.exp(1j * phi * scale[:, None, None])
    return x


# ----------------------------------------------------------------------------
if __name__ == "__main__":
    key = jax.random.PRNGKey(0)
    B, L, Nmodes = 4, 144, 2
    DBP_info = {
        'step': 2, 'dtaps': 5, 'ntaps': 5, 'type': 'FDBP', 'Nmodes': Nmodes,
        'L': 2000e3, 'D': 16.5, 'Fc': 299792458 / 1550e-9, 'gamma': 0.0016567,
        'task_dim': 4, 'task_hidden_dim': 16,
    }
    Fc = DBP_info['Fc']

    k1, k2, k3 = jax.random.split(key, 3)
    x = (jax.random.normal(k1, (B, L, Nmodes))
         + 1j * jax.random.normal(k2, (B, L, Nmodes))).astype(jnp.complex64)
    # task_info: [P(dBm), Fi(Hz), Fs(Hz), Nch]
    task_info = jnp.stack([
        jnp.array([0.0, 1.0, 2.0, -1.0]),
        jnp.array([Fc - 50e9, Fc, Fc + 50e9, Fc + 100e9]),
        jnp.array([80e9, 80e9, 80e9, 80e9]),
        jnp.array([1.0, 3.0, 5.0, 7.0]),
    ], axis=1).astype(jnp.float32)

    # FDBP learned nonlinear filter parameter (deterministic synthetic init).
    nl_param = (0.01 * jax.random.normal(
        k3, (DBP_info['ntaps'] * Nmodes ** 2,))).astype(jnp.float32)

    y = jax.block_until_ready(ldbp_forward(x, task_info, DBP_info, nl_param))

    y_ref = jax.block_until_ready(ldbp_reference(x, task_info, DBP_info, nl_param))
    expected_len = L - DBP_info['step'] * (DBP_info['dtaps'] - 1 + DBP_info['ntaps'] - 1)
    assert y.shape == (B, expected_len, Nmodes), y.shape
    np.testing.assert_allclose(np.asarray(y), np.asarray(y_ref), rtol=2e-3, atol=2e-3)

    print("KERNEL_OK")
</pallas_src>

<mosaic_0001>
module attributes {stable_mosaic.version = 11 : i64} {
  func.func @_ldbp_tile_kernel(%arg0: i32, %arg1: i32, %arg2: memref<1x16x256xf32, #tpu.memory_space<vmem>>, %arg3: memref<1x16x5xf32, #tpu.memory_space<vmem>>, %arg4: memref<1x16x5xf32, #tpu.memory_space<vmem>>, %arg5: memref<1x16x128xf32, #tpu.memory_space<vmem>>) attributes {dimension_semantics = [#tpu.dimension_semantics<parallel>, #tpu.dimension_semantics<parallel>], iteration_bounds = array<i64: 1, 1>, scalar_prefetch = 0 : i64, scratch_operands = 0 : i64, tpu.core_type = #tpu.core_type<tc>, window_params = [{transform_indices = @transform_0, window_bounds = array<i64: 1, 16, 256>}, {transform_indices = @transform_1, window_bounds = array<i64: 1, 16, 5>}, {transform_indices = @transform_2, window_bounds = array<i64: 1, 16, 5>}, {transform_indices = @transform_3, window_bounds = array<i64: 1, 16, 128>}]} {
    %c128_i32 = arith.constant 128 : i32
    %0 = arith.muli %arg1, %c128_i32 : i32
    %1 = tpu.assume_multiple %0, 128 : i32
    %c0 = arith.constant 0 : index
    %c0_0 = arith.constant 0 : index
    %2 = arith.index_cast %1 : i32 to index
    %3 = vector.load %arg2[%c0, %c0_0, %2] : memref<1x16x256xf32, #tpu.memory_space<vmem>>, vector<1x16x256xf32>
    %4 = vector.shape_cast %3 : vector<1x16x256xf32> to vector<16x256xf32>
    %5 = vector.extract_strided_slice %4 {offsets = [0, 0], sizes = [8, 256], strides = [1, 1]} : vector<16x256xf32> to vector<8x256xf32>
    %6 = vector.extract_strided_slice %4 {offsets = [8, 0], sizes = [8, 256], strides = [1, 1]} : vector<16x256xf32> to vector<8x256xf32>
    %c0_1 = arith.constant 0 : index
    %c0_2 = arith.constant 0 : index
    %c0_3 = arith.constant 0 : index
    %7 = vector.load %arg3[%c0_1, %c0_2, %c0_3] : memref<1x16x5xf32, #tpu.memory_space<vmem>>, vector<1x16x5xf32>
    %8 = vector.shape_cast %7 : vector<1x16x5xf32> to vector<16x5xf32>
    %c0_4 = arith.constant 0 : index
    %c0_5 = arith.constant 0 : index
    %c0_6 = arith.constant 0 : index
    %9 = vector.load %arg4[%c0_4, %c0_5, %c0_6] : memref<1x16x5xf32, #tpu.memory_space<vmem>>, vector<1x16x5xf32>
    %10 = vector.shape_cast %9 : vector<1x16x5xf32> to vector<16x5xf32>
    %11 = vector.extract_strided_slice %8 {offsets = [0, 0], sizes = [8, 1], strides = [1, 1]} : vector<16x5xf32> to vector<8x1xf32>
    %12 = vector.extract_strided_slice %8 {offsets = [0, 1], sizes = [8, 1], strides = [1, 1]} : vector<16x5xf32> to vector<8x1xf32>
    %13 = vector.extract_strided_slice %8 {offsets = [0, 2], sizes = [8, 1], strides = [1, 1]} : vector<16x5xf32> to vector<8x1xf32>
    %14 = vector.extract_strided_slice %8 {offsets = [0, 3], sizes = [8, 1], strides = [1, 1]} : vector<16x5xf32> to vector<8x1xf32>
    %15 = vector.extract_strided_slice %8 {offsets = [0, 4], sizes = [8, 1], strides = [1, 1]} : vector<16x5xf32> to vector<8x1xf32>
    %16 = vector.extract_strided_slice %8 {offsets = [8, 0], sizes = [8, 1], strides = [1, 1]} : vector<16x5xf32> to vector<8x1xf32>
    %17 = vector.extract_strided_slice %8 {offsets = [8, 1], sizes = [8, 1], strides = [1, 1]} : vector<16x5xf32> to vector<8x1xf32>
    %18 = vector.extract_strided_slice %8 {offsets = [8, 2], sizes = [8, 1], strides = [1, 1]} : vector<16x5xf32> to vector<8x1xf32>
    %19 = vector.extract_strided_slice %8 {offsets = [8, 3], sizes = [8, 1], strides = [1, 1]} : vector<16x5xf32> to vector<8x1xf32>
    %20 = vector.extract_strided_slice %8 {offsets = [8, 4], sizes = [8, 1], strides = [1, 1]} : vector<16x5xf32> to vector<8x1xf32>
    %21 = vector.extract_strided_slice %10 {offsets = [0, 0], sizes = [8, 1], strides = [1, 1]} : vector<16x5xf32> to vector<8x1xf32>
    %22 = vector.extract_strided_slice %10 {offsets = [0, 1], sizes = [8, 1], strides = [1, 1]} : vector<16x5xf32> to vector<8x1xf32>
    %23 = vector.extract_strided_slice %10 {offsets = [0, 2], sizes = [8, 1], strides = [1, 1]} : vector<16x5xf32> to vector<8x1xf32>
    %24 = vector.extract_strided_slice %10 {offsets = [0, 3], sizes = [8, 1], strides = [1, 1]} : vector<16x5xf32> to vector<8x1xf32>
    %25 = vector.extract_strided_slice %10 {offsets = [0, 4], sizes = [8, 1], strides = [1, 1]} : vector<16x5xf32> to vector<8x1xf32>
    %26 = vector.extract_strided_slice %10 {offsets = [8, 0], sizes = [8, 1], strides = [1, 1]} : vector<16x5xf32> to vector<8x1xf32>
    %27 = vector.extract_strided_slice %10 {offsets = [8, 1], sizes = [8, 1], strides = [1, 1]} : vector<16x5xf32> to vector<8x1xf32>
    %28 = vector.extract_strided_slice %10 {offsets = [8, 2], sizes = [8, 1], strides = [1, 1]} : vector<16x5xf32> to vector<8x1xf32>
    %29 = vector.extract_strided_slice %10 {offsets = [8, 3], sizes = [8, 1], strides = [1, 1]} : vector<16x5xf32> to vector<8x1xf32>
    %30 = vector.extract_strided_slice %10 {offsets = [8, 4], sizes = [8, 1], strides = [1, 1]} : vector<16x5xf32> to vector<8x1xf32>
    %31 = vector.broadcast %11 : vector<8x1xf32> to vector<8x256xf32>
    %32 = arith.mulf %5, %31 : vector<8x256xf32>
    %33 = vector.broadcast %16 : vector<8x1xf32> to vector<8x256xf32>
    %34 = arith.mulf %6, %33 : vector<8x256xf32>
    %35 = arith.subf %32, %34 : vector<8x256xf32>
    %36 = vector.broadcast %16 : vector<8x1xf32> to vector<8x256xf32>
    %37 = arith.mulf %5, %36 : vector<8x256xf32>
    %38 = vector.broadcast %11 : vector<8x1xf32> to vector<8x256xf32>
    %39 = arith.mulf %6, %38 : vector<8x256xf32>
    %40 = arith.addf %37, %39 : vector<8x256xf32>
    %c255_i32 = arith.constant 255 : i32
    %41 = tpu.dynamic_rotate %5 by %c255_i32 dim 1 : vector<8x256xf32>, i32 -> vector<8x256xf32>
    %c255_i32_7 = arith.constant 255 : i32
    %42 = tpu.dynamic_rotate %6 by %c255_i32_7 dim 1 : vector<8x256xf32>, i32 -> vector<8x256xf32>
    %43 = vector.broadcast %12 : vector<8x1xf32> to vector<8x256xf32>
    %44 = arith.mulf %41, %43 : vector<8x256xf32>
    %45 = arith.addf %35, %44 : vector<8x256xf32>
    %46 = vector.broadcast %17 : vector<8x1xf32> to vector<8x256xf32>
    %47 = arith.mulf %42, %46 : vector<8x256xf32>
    %48 = arith.subf %45, %47 : vector<8x256xf32>
    %49 = vector.broadcast %17 : vector<8x1xf32> to vector<8x256xf32>
    %50 = arith.mulf %41, %49 : vector<8x256xf32>
    %51 = arith.addf %40, %50 : vector<8x256xf32>
    %52 = vector.broadcast %12 : vector<8x1xf32> to vector<8x256xf32>
    %53 = arith.mulf %42, %52 : vector<8x256xf32>
    %54 = arith.addf %51, %53 : vector<8x256xf32>
    %c254_i32 = arith.constant 254 : i32
    %55 = tpu.dynamic_rotate %5 by %c254_i32 dim 1 : vector<8x256xf32>, i32 -> vector<8x256xf32>
    %c254_i32_8 = arith.constant 254 : i32
    %56 = tpu.dynamic_rotate %6 by %c254_i32_8 dim 1 : vector<8x256xf32>, i32 -> vector<8x256xf32>
    %57 = vector.broadcast %13 : vector<8x1xf32> to vector<8x256xf32>
    %58 = arith.mulf %55, %57 : vector<8x256xf32>
    %59 = arith.addf %48, %58 : vector<8x256xf32>
    %60 = vector.broadcast %18 : vector<8x1xf32> to vector<8x256xf32>
    %61 = arith.mulf %56, %60 : vector<8x256xf32>
    %62 = arith.subf %59, %61 : vector<8x256xf32>
    %63 = vector.broadcast %18 : vector<8x1xf32> to vector<8x256xf32>
    %64 = arith.mulf %55, %63 : vector<8x256xf32>
    %65 = arith.addf %54, %64 : vector<8x256xf32>
    %66 = vector.broadcast %13 : vector<8x1xf32> to vector<8x256xf32>
    %67 = arith.mulf %56, %66 : vector<8x256xf32>
    %68 = arith.addf %65, %67 : vector<8x256xf32>
    %c253_i32 = arith.constant 253 : i32
    %69 = tpu.dynamic_rotate %5 by %c253_i32 dim 1 : vector<8x256xf32>, i32 -> vector<8x256xf32>
    %c253_i32_9 = arith.constant 253 : i32
    %70 = tpu.dynamic_rotate %6 by %c253_i32_9 dim 1 : vector<8x256xf32>, i32 -> vector<8x256xf32>
    %71 = vector.broadcast %14 : vector<8x1xf32> to vector<8x256xf32>
    %72 = arith.mulf %69, %71 : vector<8x256xf32>
    %73 = arith.addf %62, %72 : vector<8x256xf32>
    %74 = vector.broadcast %19 : vector<8x1xf32> to vector<8x256xf32>
    %75 = arith.mulf %70, %74 : vector<8x256xf32>
    %76 = arith.subf %73, %75 : vector<8x256xf32>
    %77 = vector.broadcast %19 : vector<8x1xf32> to vector<8x256xf32>
    %78 = arith.mulf %69, %77 : vector<8x256xf32>
    %79 = arith.addf %68, %78 : vector<8x256xf32>
    %80 = vector.broadcast %14 : vector<8x1xf32> to vector<8x256xf32>
    %81 = arith.mulf %70, %80 : vector<8x256xf32>
    %82 = arith.addf %79, %81 : vector<8x256xf32>
    %c252_i32 = arith.constant 252 : i32
    %83 = tpu.dynamic_rotate %5 by %c252_i32 dim 1 : vector<8x256xf32>, i32 -> vector<8x256xf32>
    %c252_i32_10 = arith.constant 252 : i32
    %84 = tpu.dynamic_rotate %6 by %c252_i32_10 dim 1 : vector<8x256xf32>, i32 -> vector<8x256xf32>
    %85 = vector.broadcast %15 : vector<8x1xf32> to vector<8x256xf32>
    %86 = arith.mulf %83, %85 : vector<8x256xf32>
    %87 = arith.addf %76, %86 : vector<8x256xf32>
    %88 = vector.broadcast %20 : vector<8x1xf32> to vector<8x256xf32>
    %89 = arith.mulf %84, %88 : vector<8x256xf32>
    %90 = arith.subf %87, %89 : vector<8x256xf32>
    %91 = vector.broadcast %20 : vector<8x1xf32> to vector<8x256xf32>
    %92 = arith.mulf %83, %91 : vector<8x256xf32>
    %93 = arith.addf %82, %92 : vector<8x256xf32>
    %94 = vector.broadcast %15 : vector<8x1xf32> to vector<8x256xf32>
    %95 = arith.mulf %84, %94 : vector<8x256xf32>
    %96 = arith.addf %93, %95 : vector<8x256xf32>
    %97 = arith.mulf %90, %90 : vector<8x256xf32>
    %98 = arith.mulf %96, %96 : vector<8x256xf32>
    %99 = arith.addf %97, %98 : vector<8x256xf32>
    %100 = vector.broadcast %21 : vector<8x1xf32> to vector<8x256xf32>
    %101 = arith.mulf %99, %100 : vector<8x256xf32>
    %102 = vector.broadcast %26 : vector<8x1xf32> to vector<8x256xf32>
    %103 = arith.mulf %99, %102 : vector<8x256xf32>
    %c255_i32_11 = arith.constant 255 : i32
    %104 = tpu.dynamic_rotate %99 by %c255_i32_11 dim 1 : vector<8x256xf32>, i32 -> vector<8x256xf32>
    %105 = vector.broadcast %22 : vector<8x1xf32> to vector<8x256xf32>
    %106 = arith.mulf %104, %105 : vector<8x256xf32>
    %107 = arith.addf %101, %106 : vector<8x256xf32>
    %108 = vector.broadcast %27 : vector<8x1xf32> to vector<8x256xf32>
    %109 = arith.mulf %104, %108 : vector<8x256xf32>
    %110 = arith.addf %103, %109 : vector<8x256xf32>
    %c254_i32_12 = arith.constant 254 : i32
    %111 = tpu.dynamic_rotate %99 by %c254_i32_12 dim 1 : vector<8x256xf32>, i32 -> vector<8x256xf32>
    %112 = vector.broadcast %23 : vector<8x1xf32> to vector<8x256xf32>
    %113 = arith.mulf %111, %112 : vector<8x256xf32>
    %114 = arith.addf %107, %113 : vector<8x256xf32>
    %115 = vector.broadcast %28 : vector<8x1xf32> to vector<8x256xf32>
    %116 = arith.mulf %111, %115 : vector<8x256xf32>
    %117 = arith.addf %110, %116 : vector<8x256xf32>
    %c253_i32_13 = arith.constant 253 : i32
    %118 = tpu.dynamic_rotate %99 by %c253_i32_13 dim 1 : vector<8x256xf32>, i32 -> vector<8x256xf32>
    %119 = vector.broadcast %24 : vector<8x1xf32> to vector<8x256xf32>
    %120 = arith.mulf %118, %119 : vector<8x256xf32>
    %121 = arith.addf %114, %120 : vector<8x256xf32>
    %122 = vector.broadcast %29 : vector<8x1xf32> to vector<8x256xf32>
    %123 = arith.mulf %118, %122 : vector<8x256xf32>
    %124 = arith.addf %117, %123 : vector<8x256xf32>
    %c252_i32_14 = arith.constant 252 : i32
    %125 = tpu.dynamic_rotate %99 by %c252_i32_14 dim 1 : vector<8x256xf32>, i32 -> vector<8x256xf32>
    %126 = vector.broadcast %25 : vector<8x1xf32> to vector<8x256xf32>
    %127 = arith.mulf %125, %126 : vector<8x256xf32>
    %128 = arith.addf %121, %127 : vector<8x256xf32>
    %129 = vector.broadcast %30 : vector<8x1xf32> to vector<8x256xf32>
    %130 = arith.mulf %125, %129 : vector<8x256xf32>
    %131 = arith.addf %124, %130 : vector<8x256xf32>
    %c4_i32 = arith.constant 4 : i32
    %132 = tpu.dynamic_rotate %131 by %c4_i32 dim 0 : vector<8x256xf32>, i32 -> vector<8x256xf32>
    %133 = arith.addf %128, %132 : vector<8x256xf32>
    %c254_i32_15 = arith.constant 254 : i32
    %134 = tpu.dynamic_rotate %90 by %c254_i32_15 dim 1 : vector<8x256xf32>, i32 -> vector<8x256xf32>
    %c254_i32_16 = arith.constant 254 : i32
    %135 = tpu.dynamic_rotate %96 by %c254_i32_16 dim 1 : vector<8x256xf32>, i32 -> vector<8x256xf32>
    %136 = math.cos %133 : vector<8x256xf32>
    %137 = math.sin %133 : vector<8x256xf32>
    %138 = arith.mulf %134, %136 : vector<8x256xf32>
    %139 = arith.mulf %135, %137 : vector<8x256xf32>
    %140 = arith.subf %138, %139 : vector<8x256xf32>
    %141 = arith.mulf %134, %137 : vector<8x256xf32>
    %142 = arith.mulf %135, %136 : vector<8x256xf32>
    %143 = arith.addf %141, %142 : vector<8x256xf32>
    %144 = vector.broadcast %11 : vector<8x1xf32> to vector<8x256xf32>
    %145 = arith.mulf %140, %144 : vector<8x256xf32>
    %146 = vector.broadcast %16 : vector<8x1xf32> to vector<8x256xf32>
    %147 = arith.mulf %143, %146 : vector<8x256xf32>
    %148 = arith.subf %145, %147 : vector<8x256xf32>
    %149 = vector.broadcast %16 : vector<8x1xf32> to vector<8x256xf32>
    %150 = arith.mulf %140, %149 : vector<8x256xf32>
    %151 = vector.broadcast %11 : vector<8x1xf32> to vector<8x256xf32>
    %152 = arith.mulf %143, %151 : vector<8x256xf32>
    %153 = arith.addf %150, %152 : vector<8x256xf32>
    %c255_i32_17 = arith.constant 255 : i32
    %154 = tpu.dynamic_rotate %140 by %c255_i32_17 dim 1 : vector<8x256xf32>, i32 -> vector<8x256xf32>
    %c255_i32_18 = arith.constant 255 : i32
    %155 = tpu.dynamic_rotate %143 by %c255_i32_18 dim 1 : vector<8x256xf32>, i32 -> vector<8x256xf32>
    %156 = vector.broadcast %12 : vector<8x1xf32> to vector<8x256xf32>
    %157 = arith.mulf %154, %156 : vector<8x256xf32>
    %158 = arith.addf %148, %157 : vector<8x256xf32>
    %159 = vector.broadcast %17 : vector<8x1xf32> to vector<8x256xf32>
    %160 = arith.mulf %155, %159 : vector<8x256xf32>
    %161 = arith.subf %158, %160 : vector<8x256xf32>
    %162 = vector.broadcast %17 : vector<8x1xf32> to vector<8x256xf32>
    %163 = arith.mulf %154, %162 : vector<8x256xf32>
    %164 = arith.addf %153, %163 : vector<8x256xf32>
    %165 = vector.broadcast %12 : vector<8x1xf32> to vector<8x256xf32>
    %166 = arith.mulf %155, %165 : vector<8x256xf32>
    %167 = arith.addf %164, %166 : vector<8x256xf32>
    %c254_i32_19 = arith.constant 254 : i32
    %168 = tpu.dynamic_rotate %140 by %c254_i32_19 dim 1 : vector<8x256xf32>, i32 -> vector<8x256xf32>
    %c254_i32_20 = arith.constant 254 : i32
    %169 = tpu.dynamic_rotate %143 by %c254_i32_20 dim 1 : vector<8x256xf32>, i32 -> vector<8x256xf32>
    %170 = vector.broadcast %13 : vector<8x1xf32> to vector<8x256xf32>
    %171 = arith.mulf %168, %170 : vector<8x256xf32>
    %172 = arith.addf %161, %171 : vector<8x256xf32>
    %173 = vector.broadcast %18 : vector<8x1xf32> to vector<8x256xf32>
    %174 = arith.mulf %169, %173 : vector<8x256xf32>
    %175 = arith.subf %172, %174 : vector<8x256xf32>
    %176 = vector.broadcast %18 : vector<8x1xf32> to vector<8x256xf32>
    %177 = arith.mulf %168, %176 : vector<8x256xf32>
    %178 = arith.addf %167, %177 : vector<8x256xf32>
    %179 = vector.broadcast %13 : vector<8x1xf32> to vector<8x256xf32>
    %180 = arith.mulf %169, %179 : vector<8x256xf32>
    %181 = arith.addf %178, %180 : vector<8x256xf32>
    %c253_i32_21 = arith.constant 253 : i32
    %182 = tpu.dynamic_rotate %140 by %c253_i32_21 dim 1 : vector<8x256xf32>, i32 -> vector<8x256xf32>
    %c253_i32_22 = arith.constant 253 : i32
    %183 = tpu.dynamic_rotate %143 by %c253_i32_22 dim 1 : vector<8x256xf32>, i32 -> vector<8x256xf32>
    %184 = vector.broadcast %14 : vector<8x1xf32> to vector<8x256xf32>
    %185 = arith.mulf %182, %184 : vector<8x256xf32>
    %186 = arith.addf %175, %185 : vector<8x256xf32>
    %187 = vector.broadcast %19 : vector<8x1xf32> to vector<8x256xf32>
    %188 = arith.mulf %183, %187 : vector<8x256xf32>
    %189 = arith.subf %186, %188 : vector<8x256xf32>
    %190 = vector.broadcast %19 : vector<8x1xf32> to vector<8x256xf32>
    %191 = arith.mulf %182, %190 : vector<8x256xf32>
    %192 = arith.addf %181, %191 : vector<8x256xf32>
    %193 = vector.broadcast %14 : vector<8x1xf32> to vector<8x256xf32>
    %194 = arith.mulf %183, %193 : vector<8x256xf32>
    %195 = arith.addf %192, %194 : vector<8x256xf32>
    %c252_i32_23 = arith.constant 252 : i32
    %196 = tpu.dynamic_rotate %140 by %c252_i32_23 dim 1 : vector<8x256xf32>, i32 -> vector<8x256xf32>
    %c252_i32_24 = arith.constant 252 : i32
    %197 = tpu.dynamic_rotate %143 by %c252_i32_24 dim 1 : vector<8x256xf32>, i32 -> vector<8x256xf32>
    %198 = vector.broadcast %15 : vector<8x1xf32> to vector<8x256xf32>
    %199 = arith.mulf %196, %198 : vector<8x256xf32>
    %200 = arith.addf %189, %199 : vector<8x256xf32>
    %201 = vector.broadcast %20 : vector<8x1xf32> to vector<8x256xf32>
    %202 = arith.mulf %197, %201 : vector<8x256xf32>
    %203 = arith.subf %200, %202 : vector<8x256xf32>
    %204 = vector.broadcast %20 : vector<8x1xf32> to vector<8x256xf32>
    %205 = arith.mulf %196, %204 : vector<8x256xf32>
    %206 = arith.addf %195, %205 : vector<8x256xf32>
    %207 = vector.broadcast %15 : vector<8x1xf32> to vector<8x256xf32>
    %208 = arith.mulf %197, %207 : vector<8x256xf32>
    %209 = arith.addf %206, %208 : vector<8x256xf32>
    %210 = arith.mulf %203, %203 : vector<8x256xf32>
    %211 = arith.mulf %209, %209 : vector<8x256xf32>
    %212 = arith.addf %210, %211 : vector<8x256xf32>
    %213 = vector.broadcast %21 : vector<8x1xf32> to vector<8x256xf32>
    %214 = arith.mulf %212, %213 : vector<8x256xf32>
    %215 = vector.broadcast %26 : vector<8x1xf32> to vector<8x256xf32>
    %216 = arith.mulf %212, %215 : vector<8x256xf32>
    %c255_i32_25 = arith.constant 255 : i32
    %217 = tpu.dynamic_rotate %212 by %c255_i32_25 dim 1 : vector<8x256xf32>, i32 -> vector<8x256xf32>
    %218 = vector.broadcast %22 : vector<8x1xf32> to vector<8x256xf32>
    %219 = arith.mulf %217, %218 : vector<8x256xf32>
    %220 = arith.addf %214, %219 : vector<8x256xf32>
    %221 = vector.broadcast %27 : vector<8x1xf32> to vector<8x256xf32>
    %222 = arith.mulf %217, %221 : vector<8x256xf32>
    %223 = arith.addf %216, %222 : vector<8x256xf32>
    %c254_i32_26 = arith.constant 254 : i32
    %224 = tpu.dynamic_rotate %212 by %c254_i32_26 dim 1 : vector<8x256xf32>, i32 -> vector<8x256xf32>
    %225 = vector.broadcast %23 : vector<8x1xf32> to vector<8x256xf32>
    %226 = arith.mulf %224, %225 : vector<8x256xf32>
    %227 = arith.addf %220, %226 : vector<8x256xf32>
    %228 = vector.broadcast %28 : vector<8x1xf32> to vector<8x256xf32>
    %229 = arith.mulf %224, %228 : vector<8x256xf32>
    %230 = arith.addf %223, %229 : vector<8x256xf32>
    %c253_i32_27 = arith.constant 253 : i32
    %231 = tpu.dynamic_rotate %212 by %c253_i32_27 dim 1 : vector<8x256xf32>, i32 -> vector<8x256xf32>
    %232 = vector.broadcast %24 : vector<8x1xf32> to vector<8x256xf32>
    %233 = arith.mulf %231, %232 : vector<8x256xf32>
    %234 = arith.addf %227, %233 : vector<8x256xf32>
    %235 = vector.broadcast %29 : vector<8x1xf32> to vector<8x256xf32>
    %236 = arith.mulf %231, %235 : vector<8x256xf32>
    %237 = arith.addf %230, %236 : vector<8x256xf32>
    %c252_i32_28 = arith.constant 252 : i32
    %238 = tpu.dynamic_rotate %212 by %c252_i32_28 dim 1 : vector<8x256xf32>, i32 -> vector<8x256xf32>
    %239 = vector.broadcast %25 : vector<8x1xf32> to vector<8x256xf32>
    %240 = arith.mulf %238, %239 : vector<8x256xf32>
    %241 = arith.addf %234, %240 : vector<8x256xf32>
    %242 = vector.broadcast %30 : vector<8x1xf32> to vector<8x256xf32>
    %243 = arith.mulf %238, %242 : vector<8x256xf32>
    %244 = arith.addf %237, %243 : vector<8x256xf32>
    %c4_i32_29 = arith.constant 4 : i32
    %245 = tpu.dynamic_rotate %244 by %c4_i32_29 dim 0 : vector<8x256xf32>, i32 -> vector<8x256xf32>
    %246 = arith.addf %241, %245 : vector<8x256xf32>
    %c254_i32_30 = arith.constant 254 : i32
    %247 = tpu.dynamic_rotate %203 by %c254_i32_30 dim 1 : vector<8x256xf32>, i32 -> vector<8x256xf32>
    %c254_i32_31 = arith.constant 254 : i32
    %248 = tpu.dynamic_rotate %209 by %c254_i32_31 dim 1 : vector<8x256xf32>, i32 -> vector<8x256xf32>
    %249 = math.cos %246 : vector<8x256xf32>
    %250 = math.sin %246 : vector<8x256xf32>
    %251 = arith.mulf %247, %249 : vector<8x256xf32>
    %252 = arith.mulf %248, %250 : vector<8x256xf32>
    %253 = arith.subf %251, %252 : vector<8x256xf32>
    %254 = arith.mulf %247, %250 : vector<8x256xf32>
    %255 = arith.mulf %248, %249 : vector<8x256xf32>
    %256 = arith.addf %254, %255 : vector<8x256xf32>
    %257 = vector.extract_strided_slice %253 {offsets = [0, 0], sizes = [8, 128], strides = [1, 1]} : vector<8x256xf32> to vector<8x128xf32>
    %c0_32 = arith.constant 0 : index
    %c0_33 = arith.constant 0 : index
    %c0_34 = arith.constant 0 : index
    %258 = vector.load %arg5[%c0_32, %c0_33, %c0_34] : memref<1x16x128xf32, #tpu.memory_space<vmem>>, vector<1x8x128xf32>
    %259 = vector.shape_cast %258 : vector<1x8x128xf32> to vector<8x128xf32>
    %260 = vector.shape_cast %257 : vector<8x128xf32> to vector<1x8x128xf32>
    tpu.vector_store %arg5[%c0_32, %c0_33, %c0_34], %260 {strides = array<i32>} : memref<1x16x128xf32, #tpu.memory_space<vmem>>, vector<1x8x128xf32>,
    %261 = vector.extract_strided_slice %256 {offsets = [0, 0], sizes = [8, 128], strides = [1, 1]} : vector<8x256xf32> to vector<8x128xf32>
    %c0_35 = arith.constant 0 : index
    %c8 = arith.constant 8 : index
    %c0_36 = arith.constant 0 : index
    %262 = vector.load %arg5[%c0_35, %c8, %c0_36] : memref<1x16x128xf32, #tpu.memory_space<vmem>>, vector<1x8x128xf32>
    %263 = vector.shape_cast %262 : vector<1x8x128xf32> to vector<8x128xf32>
    %264 = vector.shape_cast %261 : vector<8x128xf32> to vector<1x8x128xf32>
    tpu.vector_store %arg5[%c0_35, %c8, %c0_36], %264 {strides = array<i32>} : memref<1x16x128xf32, #tpu.memory_space<vmem>>, vector<1x8x128xf32>,
    return
  }
  func.func @transform_0(%arg0: i32, %arg1: i32) -> (i32, i32, i32) {
    %c0_i32 = arith.constant 0 : i32
    %c0_i32_0 = arith.constant 0 : i32
    %c0_i32_1 = arith.constant 0 : i32
    return %arg0, %c0_i32, %c0_i32_0 : i32, i32, i32
  }
  func.func @transform_1(%arg0: i32, %arg1: i32) -> (i32, i32, i32) {
    %c0_i32 = arith.constant 0 : i32
    %c0_i32_0 = arith.constant 0 : i32
    %c0_i32_1 = arith.constant 0 : i32
    return %arg0, %c0_i32, %c0_i32_0 : i32, i32, i32
  }
  func.func @transform_2(%arg0: i32, %arg1: i32) -> (i32, i32, i32) {
    %c0_i32 = arith.constant 0 : i32
    %c0_i32_0 = arith.constant 0 : i32
    %c0_i32_1 = arith.constant 0 : i32
    return %arg0, %c0_i32, %c0_i32_0 : i32, i32, i32
  }
  func.func @transform_3(%arg0: i32, %arg1: i32) -> (i32, i32, i32) {
    %c0_i32 = arith.constant 0 : i32
    %c0_i32_0 = arith.constant 0 : i32
    return %arg0, %c0_i32, %arg1 : i32, i32, i32
  }
}

</mosaic_0001>

<bundles_post_ra>
// kernel: tpu_custom_call.1
= control target key start
LH: loop header
LB: loop body
LE: loop exit
PB: predicated region body
PF: predicated region fallthrough
CT: control target
= control target key end

     0   :  { %v1267_v1 = vmov 1   ;;  %v1268_v2 = vmov 0   ;;  %s1807_s0 = inlined_call_operand.vmem [shape: f32[1,16,256], index: 0, kind: input, shape index: {}]   ;;  %s1808_s1 = inlined_call_operand.vmem [shape: f32[1,16,5], index: 1, kind: input, shape index: {}]   ;;  %s1809_s2 = inlined_call_operand.vmem [shape: f32[1,16,5], index: 2, kind: input, shape index: {}]   ;;  %s1810_s3 = inlined_call_operand.hbm [shape: f32[1,16,128], index: 3, kind: output, shape index: {}]  }
   0x1   :  { %v24_v0 = vld [vmem:[%s1808_s1] sm:$0xff]  ;;  %1218 = vset.pattern.permute.xlu1 %v1267_v1  ;;  %1217 = vset.pattern.permute.xlu0 %v1268_v2  ;;  %v25_v3 = vld [vmem:[%s1808_s1 + $0x8] sm:$0xff] }
   0x2   :  { %66 = vperm.xlu1 %1218, %v24_v0   ;;  %30 = vperm.xlu0 %1217, %v24_v0  }
   0x3   :  { %8 = vsyncpa [#allocation3], 0  ;;  %v1314_v4 = vld [vmem:[%s1807_s0 + $0x8] sm:$0xff]  ;;  %v1319_v5 = vld [vmem:[%s1807_s0] sm:$0xff]  ;;  %s1269_s20 = smov 127   ;;  %v1270_v6 = vmov 2   ;;  %v54_v23 = vlaneseq }
   0x4   :  { %v1328_v7 = vld [vmem:[%s1807_s0 + $0x10] sm:$0xff]  ;;  %v1333_v8 = vld [vmem:[%s1807_s0 + $0x18] sm:$0xff]  ;;  %v1271_v9 = vmov 3   ;;  %s1272_s24 = smov 126   ;;  %s1273_s0 = smov 125   ;;  %v1274_v10 = vmov 4  }
   0x5   :  { %s1275_s25 = smov 124   ;;  %v27_v11 = vld [vmem:[%s1809_s2 + $0x8] sm:$0xff]  ;;  %v26_v12 = vld [vmem:[%s1809_s2] sm:$0xff]  ;;  %v1381_v26 = vand.u32 127, %v54_v23  ;;  %s1282_s2 = smov [#allocation2]  }
   0x6   :  { %74 = vperm.xlu1 %1218, %v25_v3   ;;  %37 = vperm.xlu0 %1217, %v25_v3   ;;  %s1150_s30 = sshll.u32 %s1282_s2, 4  ;;  %s1151_s30 = int_to_ptr.vmem [resolvable:$true] %s1150_s30 }
   0x7   :  { %vm56_vm0 = vcmp.lt.s32.totalorder %v1381_v26, 127  ;;  %vm93_vm1 = vcmp.lt.s32.totalorder %v1381_v26, 126  ;;  %vm130_vm2 = vcmp.lt.s32.totalorder %v1381_v26, 125  ;;  %vm167_vm3 = vcmp.lt.s32.totalorder %v1381_v26, 124  ;;  %s1245_s4 = scalar_lea.vmem %s1151_s30, 256  ;;  %p1250_p1 = scmp.lt.s32.totalorder %s1151_s30, %s1151_s30 }
   0x8   :  { %p1246_p0 = scmp.ne.s32.totalorder %s1151_s30, %s1245_s4  ;;  %p1251_p2 = scmp.lt.s32.totalorder %s1245_s4, %s1245_s4 }
   0xa   :  { %52 = vrot.lane.b32.xlu1 %v1314_v4, %s1269_s20  ;;  %50 = vrot.lane.b32.xlu0 %v1319_v5, %s1269_s20  ;;  %p1252_p3 = por %p1251_p2, %p1250_p1 }
   0xb   :  { %1220 = vset.pattern.permute.xlu1 %v1270_v6  ;;  %1219 = vset.pattern.permute.xlu0 %v1270_v6 }
   0xc   :  { %p1253_p4 = pnand %p1252_p3, %p1246_p0 }
   0xe   :  { %111 = vperm.xlu1 %1220, %v25_v3   ;;  %103 = vperm.xlu0 %1219, %v24_v0  }
  0x12   :  { %59 = vrot.lane.b32.xlu1 %v1328_v7, %s1269_s20  ;;  %61 = vrot.lane.b32.xlu0 %v1333_v8, %s1269_s20 }
  0x13   :  { %1221 = vset.pattern.permute.xlu1 %v1271_v9  ;;  %1222 = vset.pattern.permute.xlu0 %v1271_v9 }
  0x16   :  { %89 = vrot.lane.b32.xlu1 %v1319_v5, %s1272_s24  ;;  %91 = vrot.lane.b32.xlu0 %v1314_v4, %s1272_s24 }
  0x1a   :  { %140 = vperm.xlu1 %1221, %v24_v0   ;;  %148 = vperm.xlu0 %1222, %v25_v3  }
  0x1e   :  { %96 = vrot.lane.b32.xlu1 %v1328_v7, %s1272_s24  ;;  %126 = vrot.lane.b32.xlu0 %v1319_v5, %s1273_s0 }
  0x1f   :  { %1224 = vset.pattern.permute.xlu1 %v1274_v10  ;;  %1223 = vset.pattern.permute.xlu0 %v1274_v10 }
  0x22   :  { %98 = vrot.lane.b32.xlu1 %v1333_v8, %s1272_s24  ;;  %177 = vperm.xlu0 %1223, %v24_v0  }
  0x26   :  { %128 = vrot.lane.b32.xlu1 %v1314_v4, %s1273_s0  ;;  %135 = vrot.lane.b32.xlu0 %v1333_v8, %s1273_s0 }
  0x27   :  { %1226 = vset.pattern.permute.xlu0 %v1267_v1 }
  0x2a   :  { %185 = vperm.xlu1 %1224, %v25_v3   ;;  %165 = vrot.lane.b32.xlu0 %v1314_v4, %s1275_s25 }
  0x2e   :  { %133 = vrot.lane.b32.xlu1 %v1328_v7, %s1273_s0  ;;  %172 = vrot.lane.b32.xlu0 %v1333_v8, %s1275_s25 }
  0x2f   :  { %1225 = vset.pattern.permute.xlu1 %v1268_v2 }
  0x32   :  { %163 = vrot.lane.b32.xlu1 %v1319_v5, %s1275_s25  ;;  %235 = vperm.xlu0 %1226, %v27_v11  }
  0x36   :  { %170 = vrot.lane.b32.xlu1 %v1328_v7, %s1275_s25  ;;  %1228 = vset.pattern.permute.xlu0 %v1270_v6 }
  0x37   :  { %257 = vperm.xlu0 %1228, %v27_v11  }
  0x3a   :  { %215 = vperm.xlu1 %1225, %v27_v11  }
  0x3b   :  { %249 = vperm.xlu0 %1228, %v26_v12  }
  0x3e   :  { %208 = vperm.xlu1 %1225, %v26_v12  }
  0x3f   :  { %1230 = vset.pattern.permute.xlu0 %v1271_v9 }
  0x40   :  { %271 = vperm.xlu0 %1230, %v26_v12  }
  0x42   :  { %1227 = vset.pattern.permute.xlu1 %v1267_v1 }
  0x43   :  { %227 = vperm.xlu1 %1227, %v26_v12  }
  0x44   :  { %1232 = vset.pattern.permute.xlu0 %v1274_v10 }
  0x47   :  { %1229 = vset.pattern.permute.xlu1 %v1271_v9 }
  0x48   :  { %279 = vperm.xlu1 %1229, %v27_v11  }
  0x4c   :  { %1231 = vset.pattern.permute.xlu1 %v1274_v10 }
  0x4d   :  { %301 = vperm.xlu1 %1231, %v27_v11  }
  0x51   :  { %293 = vperm.xlu1 %1231, %v26_v12  }
  0x7d   :  { %v1369_v13 = vpop.permute.xlu1 %66  ;;  %v1371_v14 = vpop.permute.xlu0 %30 }
  0x7e   :  { %v34_v31 = vmul.f32 %v1371_v14, %v1314_v4  ;;  %v33_v34 = vmul.f32 %v1371_v14, %v1319_v5  ;;  %v46_v38 = vmul.f32 %v1371_v14, %v1328_v7  ;;  %v47_v39 = vmul.f32 %v1371_v14, %v1333_v8 }
  0x81   :  { %v1373_v15 = vpop.permute.xlu1 %74  ;;  %v1375_v16 = vpop.permute.xlu0 %37 }
  0x82   :  { %v40_v32 = vmul.f32 %v1375_v16, %v1328_v7  ;;  %v41_v33 = vmul.f32 %v1375_v16, %v1333_v8  ;;  %v45_v37 = vmul.f32 %v1375_v16, %v1314_v4  ;;  %v44_v40 = vmul.f32 %v1375_v16, %v1319_v5 }
  0x84   :  { %v43_v43 = vsub.f32 %v34_v31, %v41_v33  ;;  %v42_v44 = vsub.f32 %v33_v34, %v40_v32  ;;  %v49_v49 = vadd.f32 %v47_v39, %v45_v37  ;;  %v48_v50 = vadd.f32 %v46_v38, %v44_v40 }
  0x85   :  { %v53_v17 = vpop.permute.xlu1 %52  ;;  %v51_v18 = vpop.permute.xlu0 %50 }
  0x86   :  { %v57_v35 = vsel %vm56_vm0, %v51_v18, %v53_v17  ;;  %v58_v36 = vsel %vm56_vm0, %v53_v17, %v51_v18 }
  0x87   :  { %v69_v45 = vmul.f32 %v1369_v13, %v57_v35  ;;  %v70_v46 = vmul.f32 %v1369_v13, %v58_v36  ;;  %v81_v51 = vmul.f32 %v1373_v15, %v57_v35  ;;  %v82_v52 = vmul.f32 %v1373_v15, %v58_v36 }
  0x89   :  { %v1377_v19 = vpop.permute.xlu1 %111  ;;  %v1379_v20 = vpop.permute.xlu0 %103  ;;  %v71_v56 = vadd.f32 %v69_v45, %v42_v44  ;;  %v72_v57 = vadd.f32 %v70_v46, %v43_v43  ;;  %v83_v1 = vadd.f32 %v81_v51, %v48_v50  ;;  %v84_v2 = vadd.f32 %v82_v52, %v49_v49 }
  0x8d   :  { %v60_v21 = vpop.permute.xlu1 %59  ;;  %v62_v22 = vpop.permute.xlu0 %61 }
  0x8e   :  { %v63_v47 = vsel %vm56_vm0, %v60_v21, %v62_v22  ;;  %v64_v48 = vsel %vm56_vm0, %v62_v22, %v60_v21 }
  0x8f   :  { %v77_v58 = vmul.f32 %v1373_v15, %v63_v47  ;;  %v78_v59 = vmul.f32 %v1373_v15, %v64_v48  ;;  %v85_v60 = vmul.f32 %v1369_v13, %v63_v47  ;;  %v86_v61 = vmul.f32 %v1369_v13, %v64_v48 }
  0x91   :  { %v90_v24 = vpop.permute.xlu1 %89  ;;  %v92_v25 = vpop.permute.xlu0 %91  ;;  %v79_v10 = vsub.f32 %v71_v56, %v77_v58  ;;  %v80_v11 = vsub.f32 %v72_v57, %v78_v59  ;;  %v87_v18 = vadd.f32 %v85_v60, %v83_v1  ;;  %v88_v21 = vadd.f32 %v86_v61, %v84_v2 }
  0x92   :  { %v94_v53 = vsel %vm93_vm1, %v90_v24, %v92_v25  ;;  %v95_v54 = vsel %vm93_vm1, %v92_v25, %v90_v24 }
  0x93   :  { %v106_v3 = vmul.f32 %v1379_v20, %v94_v53  ;;  %v107_v4 = vmul.f32 %v1379_v20, %v95_v54  ;;  %v118_v5 = vmul.f32 %v1377_v19, %v94_v53  ;;  %v119_v6 = vmul.f32 %v1377_v19, %v95_v54 }
  0x95   :  { %v1383_v27 = vpop.permute.xlu1 %140  ;;  %v1385_v28 = vpop.permute.xlu0 %148  ;;  %v108_v24 = vadd.f32 %v106_v3, %v79_v10  ;;  %v109_v25 = vadd.f32 %v107_v4, %v80_v11  ;;  %v120_v31 = vadd.f32 %v118_v5, %v87_v18  ;;  %v121_v32 = vadd.f32 %v119_v6, %v88_v21 }
  0x99   :  { %v97_v29 = vpop.permute.xlu1 %96  ;;  %v127_v30 = vpop.permute.xlu0 %126 }
  0x9d   :  { %v99_v41 = vpop.permute.xlu1 %98  ;;  %v1409_v42 = vpop.permute.xlu0 %177 }
  0x9e   :  { %v100_v62 = vsel %vm93_vm1, %v97_v29, %v99_v41  ;;  %v101_v63 = vsel %vm93_vm1, %v99_v41, %v97_v29 }
  0x9f   :  { %v114_v12 = vmul.f32 %v1377_v19, %v100_v62  ;;  %v115_v17 = vmul.f32 %v1377_v19, %v101_v63  ;;  %v122_v22 = vmul.f32 %v1379_v20, %v100_v62  ;;  %v123_v23 = vmul.f32 %v1379_v20, %v101_v63 }
  0xa1   :  { %v129_v55 = vpop.permute.xlu1 %128  ;;  %v136_v0 = vpop.permute.xlu0 %135  ;;  %v116_v37 = vsub.f32 %v108_v24, %v114_v12  ;;  %v117_v38 = vsub.f32 %v109_v25, %v115_v17  ;;  %v124_v41 = vadd.f32 %v122_v22, %v120_v31  ;;  %v125_v43 = vadd.f32 %v123_v23, %v121_v32 }
  0xa2   :  { %v131_v7 = vsel %vm130_vm2, %v127_v30, %v129_v55  ;;  %v132_v8 = vsel %vm130_vm2, %v129_v55, %v127_v30 }
  0xa3   :  { %v143_v29 = vmul.f32 %v1383_v27, %v131_v7  ;;  %v144_v30 = vmul.f32 %v1383_v27, %v132_v8  ;;  %v155_v33 = vmul.f32 %v1385_v28, %v131_v7  ;;  %v156_v34 = vmul.f32 %v1385_v28, %v132_v8 }
  0xa5   :  { %v1441_v9 = vpop.permute.xlu1 %185  ;;  %v166_v36 = vpop.permute.xlu0 %165  ;;  %v145_v46 = vadd.f32 %v143_v29, %v116_v37  ;;  %v146_v47 = vadd.f32 %v144_v30, %v117_v38  ;;  %v157_v50 = vadd.f32 %v155_v33, %v124_v41  ;;  %v158_v51 = vadd.f32 %v156_v34, %v125_v43 }
  0xa9   :  { %v134_v35 = vpop.permute.xlu1 %133  ;;  %v173_v61 = vpop.permute.xlu0 %172 }
  0xaa   :  { %v137_v39 = vsel %vm130_vm2, %v134_v35, %v136_v0  ;;  %v138_v40 = vsel %vm130_vm2, %v136_v0, %v134_v35 }
  0xab   :  { %v151_v44 = vmul.f32 %v1385_v28, %v137_v39  ;;  %v152_v45 = vmul.f32 %v1385_v28, %v138_v40  ;;  %v159_v48 = vmul.f32 %v1383_v27, %v137_v39  ;;  %v160_v49 = vmul.f32 %v1383_v27, %v138_v40 }
  0xad   :  { %v164_v52 = vpop.permute.xlu1 %163  ;;  %v153_v53 = vsub.f32 %v145_v46, %v151_v44  ;;  %v154_v54 = vsub.f32 %v146_v47, %v152_v45  ;;  %v161_v62 = vadd.f32 %v159_v48, %v157_v50  ;;  %v162_v63 = vadd.f32 %v160_v49, %v158_v51  ;;  %v1493_v34 = vpop.permute.xlu0 %235 }
  0xae   :  { %v168_v55 = vsel %vm167_vm3, %v164_v52, %v166_v36  ;;  %v169_v56 = vsel %vm167_vm3, %v166_v36, %v164_v52 }
  0xaf   :  { %v180_v57 = vmul.f32 %v1409_v42, %v168_v55  ;;  %v181_v58 = vmul.f32 %v1409_v42, %v169_v56  ;;  %v192_v59 = vmul.f32 %v1441_v9, %v168_v55  ;;  %v193_v60 = vmul.f32 %v1441_v9, %v169_v56 }
  0xb1   :  { %v182_v0 = vadd.f32 %v180_v57, %v153_v53  ;;  %v183_v1 = vadd.f32 %v181_v58, %v154_v54  ;;  %v171_v2 = vpop.permute.xlu1 %170  ;;  %v194_v3 = vadd.f32 %v192_v59, %v161_v62  ;;  %v195_v4 = vadd.f32 %v193_v60, %v162_v63 }
  0xb2   :  { %v174_v5 = vsel %vm167_vm3, %v171_v2, %v173_v61  ;;  %v175_v6 = vsel %vm167_vm3, %v173_v61, %v171_v2  ;;  %v1497_v36 = vpop.permute.xlu0 %257 }
  0xb3   :  { %v188_v7 = vmul.f32 %v1441_v9, %v174_v5  ;;  %v189_v8 = vmul.f32 %v1441_v9, %v175_v6  ;;  %v196_v10 = vmul.f32 %v1409_v42, %v174_v5  ;;  %v197_v11 = vmul.f32 %v1409_v42, %v175_v6 }
  0xb5   :  { %v190_v12 = vsub.f32 %v182_v0, %v188_v7  ;;  %v191_v17 = vsub.f32 %v183_v1, %v189_v8  ;;  %v198_v18 = vadd.f32 %v196_v10, %v194_v3  ;;  %v199_v21 = vadd.f32 %v197_v11, %v195_v4  ;;  %v1487_v31 = vpop.permute.xlu1 %215 }
  0xb6   :  { %v1501_v38 = vpop.permute.xlu0 %249 }
  0xb7   :  { %v200_v22 = vmul.f32 %v190_v12, %v190_v12  ;;  %v202_v23 = vmul.f32 %v198_v18, %v198_v18  ;;  %v201_v24 = vmul.f32 %v191_v17, %v191_v17  ;;  %v203_v25 = vmul.f32 %v199_v21, %v199_v21 }
  0xb9   :  { %v204_v29 = vadd.f32 %v202_v23, %v200_v22  ;;  %v205_v30 = vadd.f32 %v203_v25, %v201_v24  ;;  %v1489_v32 = vpop.permute.xlu1 %208 }
  0xbb   :  { %242 = vrot.lane.b32.xlu0 %v204_v29, %s1272_s24  ;;  %220 = vrot.lane.b32.xlu1 %v204_v29, %s1269_s20  ;;  %v1505_v40 = vpop.permute.xlu0 %271  ;;  %v218_v55 = vmul.f32 %v1487_v31, %v204_v29  ;;  %v219_v56 = vmul.f32 %v1487_v31, %v205_v30  ;;  %v211_v59 = vmul.f32 %v1489_v32, %v204_v29 }
  0xbc   :  { %v212_v60 = vmul.f32 %v1489_v32, %v205_v30 }
  0xbe   :  { %v1491_v33 = vpop.permute.xlu1 %227 }
  0xbf   :  { %266 = vrot.lane.b32.xlu0 %v205_v30, %s1273_s0  ;;  %222 = vrot.lane.b32.xlu1 %v205_v30, %s1269_s20 }
  0xc3   :  { %286 = vrot.lane.b32.xlu0 %v204_v29, %s1275_s25  ;;  %244 = vrot.lane.b32.xlu1 %v205_v30, %s1272_s24  ;;  %v1495_v35 = vpop.permute.xlu1 %279 }
  0xc7   :  { %312 = vrot.lane.b32.xlu0 %v190_v12, %s1272_s24  ;;  %264 = vrot.lane.b32.xlu1 %v204_v29, %s1273_s0 }
  0xc8   :  { %v1499_v37 = vpop.permute.xlu1 %301 }
  0xcb   :  { %318 = vrot.lane.b32.xlu0 %v198_v18, %s1272_s24  ;;  %288 = vrot.lane.b32.xlu1 %v205_v30, %s1275_s25 }
  0xcc   :  { %v1503_v39 = vpop.permute.xlu1 %293 }
  0xcf   :  { %314 = vrot.lane.b32.xlu1 %v191_v17, %s1272_s24 }
  0xd3   :  { %320 = vrot.lane.b32.xlu1 %v199_v21, %s1272_s24 }
 0x12d   :  { %v221_v41 = vpop.permute.xlu1 %220  ;;  %v243_v43 = vpop.permute.xlu0 %242 }
 0x131   :  { %v223_v44 = vpop.permute.xlu1 %222  ;;  %v267_v52 = vpop.permute.xlu0 %266 }
 0x132   :  { %v224_v45 = vsel %vm56_vm0, %v221_v41, %v223_v44  ;;  %v225_v46 = vsel %vm56_vm0, %v223_v44, %v221_v41 }
 0x133   :  { %v238_v48 = vmul.f32 %v1493_v34, %v224_v45  ;;  %v239_v49 = vmul.f32 %v1493_v34, %v225_v46  ;;  %v230_v53 = vmul.f32 %v1491_v33, %v224_v45  ;;  %v231_v54 = vmul.f32 %v1491_v33, %v225_v46 }
 0x135   :  { %v245_v47 = vpop.permute.xlu1 %244  ;;  %v240_v0 = vadd.f32 %v238_v48, %v218_v55  ;;  %v241_v1 = vadd.f32 %v239_v49, %v219_v56  ;;  %v232_v4 = vadd.f32 %v230_v53, %v211_v59  ;;  %v233_v5 = vadd.f32 %v231_v54, %v212_v60  ;;  %v287_v11 = vpop.permute.xlu0 %286 }
 0x136   :  { %v246_v50 = vsel %vm93_vm1, %v243_v43, %v245_v47  ;;  %v247_v51 = vsel %vm93_vm1, %v245_v47, %v243_v43 }
 0x137   :  { %v260_v57 = vmul.f32 %v1497_v36, %v246_v50  ;;  %v261_v58 = vmul.f32 %v1497_v36, %v247_v51  ;;  %v252_v61 = vmul.f32 %v1501_v38, %v246_v50  ;;  %v253_v62 = vmul.f32 %v1501_v38, %v247_v51 }
 0x139   :  { %v265_v63 = vpop.permute.xlu1 %264  ;;  %v262_v8 = vadd.f32 %v260_v57, %v240_v0  ;;  %v263_v10 = vadd.f32 %v261_v58, %v241_v1  ;;  %v254_v12 = vadd.f32 %v252_v61, %v232_v4  ;;  %v255_v17 = vadd.f32 %v253_v62, %v233_v5 }
 0x13a   :  { %v268_v2 = vsel %vm130_vm2, %v265_v63, %v267_v52  ;;  %v269_v3 = vsel %vm130_vm2, %v267_v52, %v265_v63 }
 0x13b   :  { %v282_v6 = vmul.f32 %v1495_v35, %v268_v2  ;;  %v283_v7 = vmul.f32 %v1495_v35, %v269_v3  ;;  %v274_v18 = vmul.f32 %v1505_v40, %v268_v2  ;;  %v275_v21 = vmul.f32 %v1505_v40, %v269_v3 }
 0x13d   :  { %v289_v22 = vpop.permute.xlu1 %288  ;;  %v284_v23 = vadd.f32 %v282_v6, %v262_v8  ;;  %v285_v24 = vadd.f32 %v283_v7, %v263_v10  ;;  %v276_v45 = vadd.f32 %v274_v18, %v254_v12  ;;  %v277_v46 = vadd.f32 %v275_v21, %v255_v17 }
 0x13e   :  { %v290_v25 = vsel %vm167_vm3, %v287_v11, %v289_v22  ;;  %v291_v29 = vsel %vm167_vm3, %v289_v22, %v287_v11  ;;  %v1276_v22 = vmov 683565275  }
 0x13f   :  { %v296_v30 = vmul.f32 %v1503_v39, %v290_v25  ;;  %v297_v41 = vmul.f32 %v1503_v39, %v291_v29  ;;  %v304_v43 = vmul.f32 %v1499_v37, %v290_v25  ;;  %v305_v44 = vmul.f32 %v1499_v37, %v291_v29 }
 0x140   :  { %v1278_v29 = vmov 2131351028  }
 0x141   :  { %v306_v47 = vadd.f32 %v304_v43, %v284_v23  ;;  %v307_v48 = vadd.f32 %v305_v44, %v285_v24  ;;  %v298_v49 = vadd.f32 %v296_v30, %v276_v45  ;;  %v299_v50 = vadd.f32 %v297_v41, %v277_v46 }
 0x142   :  { %v1277_v24 = vmov 2475754826   ;;  %v1279_v44 = vmov 2102212464  }
 0x143   :  { %v308_v51 = vrot.slane %v306_v47, 4  ;;  %v309_v52 = vrot.slane %v307_v48, 4  ;;  %v1280_v47 = vmov 920167782  }
 0x145   :  { %v1543_v53 = vadd.f32 %v308_v51, %v298_v49  ;;  %v1545_v54 = vadd.f32 %v309_v52, %v299_v50  ;;  %v1281_v50 = vmov 1326507024  }
 0x147   :  { %v327_v55 = vand.u32 2139095040, %v1543_v53  ;;  %v430_v56 = vand.u32 2139095040, %v1545_v54  ;;  %v427_v57 = vand.u32 2147483647, %v1545_v54  ;;  %v324_v58 = vand.u32 2147483647, %v1543_v53 }
 0x149   :  { %v328_v59 = vshrl.u32 %v327_v55, 23  ;;  %v431_v60 = vshrl.u32 %v430_v56, 23  ;;  %v434_v63 = vand.u32 8388607, %v427_v57  ;;  %v331_v0 = vand.u32 8388607, %v324_v58 }
 0x14b   :  { %v1163_v61 = vadd.s32 4294967169, %v328_v59  ;;  %v1167_v62 = vadd.s32 4294967169, %v431_v60  ;;  %v435_v3 = vor.u32 8388608, %v434_v63  ;;  %v332_v4 = vor.u32 8388608, %v331_v0 }
 0x14d   :  { %v334_v1 = vadd.s32 1, %v1163_v61  ;;  %v437_v2 = vadd.s32 1, %v1167_v62  ;;  %v1559_v17 = vshll.u32 %v435_v3, 8  ;;  %v1561_v18 = vshll.u32 %v332_v4, 8 }
 0x14f   :  { %vm335_vm4 = vcmp.gt.s32.totalorder %v334_v1, 0  ;;  %vm438_vm5 = vcmp.gt.s32.totalorder %v437_v2, 0 }
 0x150   :  { %v336_v5 = vsel %vm335_vm4, %v334_v1, 0  ;;  %v439_v6 = vsel %vm438_vm5, %v437_v2, 0 }
 0x151   :  { %v1555_v7 = vand.u32 31, %v336_v5  ;;  %v441_v8 = vand.u32 31, %v439_v6  ;;  %v440_v10 = vshrl.u32 %v439_v6, 5  ;;  %v1557_v11 = vshrl.u32 %v336_v5, 5 }
 0x153   :  { %v442_v12 = vsub.s32 32, %v441_v8  ;;  %v339_v21 = vsub.s32 32, %v1555_v7  ;;  %v444_v23 = vshll.u32 %v1276_v22, %v441_v8  ;;  %v447_v25 = vshll.u32 %v1277_v24, %v441_v8 }
 0x154   :  { %v450_v30 = vshll.u32 %v1278_v29, %v441_v8  ;;  %v453_v46 = vshll.u32 %v1279_v44, %v441_v8  ;;  %v456_v49 = vshll.u32 %v1280_v47, %v441_v8  ;;  %vm459_vm6 = vcmp.lt.s32.totalorder %v440_v10, 1 }
 0x155   :  { %v445_v41 = vshrl.u32 %v1277_v24, %v442_v12  ;;  %v448_v43 = vshrl.u32 %v1278_v29, %v442_v12  ;;  %v451_v45 = vshrl.u32 %v1279_v44, %v442_v12  ;;  %v454_v48 = vshrl.u32 %v1280_v47, %v442_v12 }
 0x156   :  { %v457_v51 = vshrl.u32 %v1281_v50, %v442_v12  ;;  %v443_v52 = vshrl.u32 %v1276_v22, %v442_v12  ;;  %vm461_vm7 = vcmp.lt.s32.totalorder %v440_v10, 3  ;;  %vm462_vm8 = vcmp.lt.s32.totalorder %v440_v10, 4 }
 0x157   :  { %v446_v55 = vor.u32 %v445_v41, %v444_v23  ;;  %v449_v56 = vor.u32 %v448_v43, %v447_v25  ;;  %v452_v59 = vor.u32 %v451_v45, %v450_v30  ;;  %v455_v60 = vor.u32 %v454_v48, %v453_v46 }
 0x158   :  { %v458_v61 = vor.u32 %v457_v51, %v456_v49  ;;  %v342_v5 = vshrl.u32 %v1277_v24, %v339_v21  ;;  %vm460_vm9 = vcmp.lt.s32.totalorder %v440_v10, 2  ;;  %v341_v12 = vshll.u32 %v1276_v22, %v1555_v7 }
 0x159   :  { %v463_v62 = vsel %vm459_vm6, %v443_v52, %v446_v55  ;;  %v464_v63 = vsel %vm462_vm8, %v452_v59, 2102212464  ;;  %v467_v0 = vsel %vm459_vm6, %v446_v55, %v449_v56  ;;  %v471_v1 = vsel %vm459_vm6, %v449_v56, %v452_v59 }
 0x15a   :  { %v465_v2 = vsel %vm461_vm7, %v449_v56, %v464_v63  ;;  %v468_v3 = vsel %vm462_vm8, %v455_v60, 920167782  ;;  %v472_v4 = vsel %vm462_vm8, %v458_v61, 1326507024  ;;  %v344_v41 = vshll.u32 %v1277_v24, %v1555_v7 }
 0x15b   :  { %v469_v6 = vsel %vm461_vm7, %v452_v59, %v468_v3  ;;  %v473_v8 = vsel %vm461_vm7, %v455_v60, %v472_v4  ;;  %v466_v23 = vsel %vm460_vm9, %v463_v62, %v465_v2  ;;  %v343_v10 = vor.u32 %v342_v5, %v341_v12 }
 0x15c   :  { %v470_v25 = vsel %vm460_vm9, %v467_v0, %v469_v6  ;;  %v474_v30 = vsel %vm460_vm9, %v471_v1, %v473_v8  ;;  %v345_v49 = vshrl.u32 %v1278_v29, %v339_v21  ;;  %v347_v51 = vshll.u32 %v1278_v29, %v1555_v7 }
 0x15d   :  { %v1581_v43 = vmul.u32.u64.low %v1559_v17, %v474_v30  ;;  %v1582_v45 = vmul.u32.u64.high %v1559_v17, %v474_v30, %v1581_v43  ;;  %v1585_v46 = vmul.u32.u64.low %v1559_v17, %v470_v25  ;;  %v1586_v48 = vmul.u32.u64.high %v1559_v17, %v470_v25, %v1585_v46 }
 0x15e   :  { %v348_v52 = vshrl.u32 %v1279_v44, %v339_v21  ;;  %v340_v55 = vshrl.u32 %v1276_v22, %v339_v21  ;;  %v350_v56 = vshll.u32 %v1279_v44, %v1555_v7  ;;  %v351_v59 = vshrl.u32 %v1280_v47, %v339_v21 }
 0x15f   :  { %v354_v60 = vshrl.u32 %v1281_v50, %v339_v21  ;;  %v482_v61 = vmul.u32 %v1559_v17, %v466_v23  ;;  %v346_v62 = vor.u32 %v345_v49, %v344_v41  ;;  %v353_v0 = vshll.u32 %v1280_v47, %v1555_v7 }
 0x160   :  { %v349_v63 = vor.u32 %v348_v52, %v347_v51  ;;  %vm484_vm10 = vc.u32 %v1582_v45, %v1585_v46  ;;  %v485_v1 = vadd.s32 1, %v1586_v48  ;;  %v352_v2 = vor.u32 %v351_v59, %v350_v56 }
 0x161   :  { %vm356_vm11 = vcmp.lt.s32.totalorder %v1557_v11, 1  ;;  %v355_v3 = vor.u32 %v354_v60, %v353_v0  ;;  %vm358_vm12 = vcmp.lt.s32.totalorder %v1557_v11, 3  ;;  %vm359_vm13 = vcmp.lt.s32.totalorder %v1557_v11, 4 }
 0x162   :  { %v364_v21 = vsel %vm356_vm11, %v343_v10, %v346_v62  ;;  %v486_v17 = vsel %vm484_vm10, %v485_v1, %v1586_v48  ;;  %v361_v4 = vsel %vm359_vm13, %v349_v63, 2102212464  ;;  %v365_v5 = vsel %vm359_vm13, %v352_v2, 920167782 }
 0x163   :  { %v368_v6 = vsel %vm356_vm11, %v346_v62, %v349_v63  ;;  %v487_v8 = vadd.s32 %v486_v17, %v482_v61  ;;  %vm357_vm14 = vcmp.lt.s32.totalorder %v1557_v11, 2  ;;  %v366_v7 = vsel %vm358_vm12, %v349_v63, %v365_v5 }
 0x164   :  { %v369_v12 = vsel %vm359_vm13, %v355_v3, 1326507024  ;;  %v360_v23 = vsel %vm356_vm11, %v340_v55, %v343_v10  ;;  %v362_v25 = vsel %vm358_vm12, %v346_v62, %v361_v4  ;;  %v367_v30 = vsel %vm357_vm14, %v364_v21, %v366_v7 }
 0x165   :  { %v370_v41 = vsel %vm358_vm12, %v352_v2, %v369_v12  ;;  %v488_v43 = vadd.s32 536870912, %v487_v8  ;;  %v1608_v51 = vmul.u32.u64.low %v1561_v18, %v367_v30  ;;  %v1609_v52 = vmul.u32.u64.high %v1561_v18, %v367_v30, %v1608_v51 }
 0x166   :  { %v371_v49 = vsel %vm357_vm14, %v368_v6, %v370_v41  ;;  %v363_v60 = vsel %vm357_vm14, %v360_v23, %v362_v25  ;;  %v483_v12 = vadd.s32 %v1585_v46, %v1582_v45  ;;  %vm429_vm6 = vcmp.lt.s32.totalorder %v1545_v54, 0 }
 0x167   :  { %v1612_v48 = vmul.u32.u64.low %v1561_v18, %v371_v49  ;;  %v1613_v56 = vmul.u32.u64.high %v1561_v18, %v371_v49, %v1612_v48  ;;  %v489_v59 = vshrl.u32 %v488_v43, 30  ;;  %v382_v11 = vadd.s32 1, %v1609_v52 }
 0x168   :  { %v379_v10 = vmul.u32 %v1561_v18, %v363_v60  ;;  %vm428_vm7 = vcmp.le.f32.partialorder %v427_v57, 0.7853982  ;;  %vm326_vm8 = vcmp.lt.s32.totalorder %v1543_v53, 0  ;;  %vm325_vm9 = vcmp.le.f32.partialorder %v324_v58, 0.7853982 }
 0x169   :  { %v490_v61 = vshll.u32 %v489_v59, 30  ;;  %vm381_vm15 = vc.u32 %v1613_v56, %v1608_v51 }
 0x16a   :  { %v383_v62 = vsel %vm381_vm15, %v382_v11, %v1609_v52 }
 0x16b   :  { %v491_v55 = vsub.s32 %v487_v8, %v490_v61  ;;  %v384_v63 = vadd.s32 %v383_v62, %v379_v10  ;;  %v380_v62 = vadd.s32 %v1608_v51, %v1613_v56 }
 0x16d   :  { %v493_v0 = vsub.s32 0, %v491_v55  ;;  %v385_v1 = vadd.s32 536870912, %v384_v63 }
 0x16f   :  { %v1168_v2 = vmin.u32 %v493_v0, %v491_v55  ;;  %v386_v3 = vshrl.u32 %v385_v1, 30 }
 0x171   :  { %v495_v21 = vclz %v1168_v2  ;;  %v387_v17 = vshll.u32 %v386_v3, 30 }
 0x173   :  { %v1169_v4 = vadd.s32 4294967294, %v495_v21  ;;  %v388_v5 = vsub.s32 %v384_v63, %v387_v17  ;;  %v513_v21 = vsub.s32 4, %v489_v59 }
 0x175   :  { %vm1170_vm4 = vcmp.lt.s32.totalorder %v1169_v4, 0  ;;  %v390_v7 = vsub.s32 0, %v388_v5  ;;  %v514_v51 = vsel %vm429_vm6, %v513_v21, %v489_v59 }
 0x176   :  { %v498_v6 = vsel %vm1170_vm4, 0, %v1169_v4  ;;  %vm519_vm4 = vweird.f32 %v1545_v54 }
 0x177   :  { %v499_v18 = vsub.s32 32, %v498_v6  ;;  %v503_v23 = vsub.s32 4294967266, %v498_v6  ;;  %v1164_v25 = vmin.u32 %v390_v7, %v388_v5  ;;  %v500_v8 = vshll.u32 %v491_v55, %v498_v6 }
 0x179   :  { %v501_v30 = vshrl.u32 %v483_v12, %v499_v18  ;;  %v504_v41 = vadd.s32 127, %v503_v23  ;;  %v392_v43 = vclz %v1164_v25  ;;  %v516_v23 = vsel %vm428_vm7, 0, %v514_v51 }
 0x17a   :  { %v520_v59 = vand.u32 3, %v516_v23 }
 0x17b   :  { %v502_v49 = vor.u32 %v501_v30, %v500_v8  ;;  %v505_v52 = vshll.u32 %v504_v41, 23  ;;  %v1165_v48 = vadd.s32 4294967294, %v392_v43  ;;  %v410_v8 = vsub.s32 4, %v386_v3 }
 0x17c   :  { %v727_v30 = vadd.s32 3, %v516_v23  ;;  %vm525_vm10 = vcmp.eq.s32.totalorder %v520_v59, 2  ;;  %vm522_vm12 = vcmp.eq.s32.totalorder %v520_v59, 0  ;;  %vm521_vm14 = vcmp.lt.s32.totalorder %v520_v59, 2 }
 0x17d   :  { %v506_v60 = vor.u32 4788187, %v505_v52  ;;  %vm1166_vm5 = vcmp.lt.s32.totalorder %v1165_v48, 0  ;;  %v509_v11 = vcvt.s32.f32 %v502_v49  ;;  %v411_v43 = vsel %vm326_vm8, %v410_v8, %v386_v3  ;;  %v1629_v49 = vpop.permute.xlu1 %314 }
 0x17e   :  { %v395_v10 = vsel %vm1166_vm5, 0, %v1165_v48  ;;  %v728_v52 = vand.u32 3, %v727_v30  ;;  %v313_v48 = vpop.permute.xlu0 %312 }
 0x17f   :  { %v507_v61 = vand.u32 2147483647, %v506_v60  ;;  %v396_v63 = vsub.s32 32, %v395_v10  ;;  %v400_v0 = vsub.s32 4294967266, %v395_v10  ;;  %v397_v46 = vshll.u32 %v388_v5, %v395_v10 }
 0x180   :  { %v413_v60 = vsel %vm325_vm9, 0, %v411_v43  ;;  %vm733_vm11 = vcmp.eq.s32.totalorder %v728_v52, 2  ;;  %vm730_vm13 = vcmp.eq.s32.totalorder %v728_v52, 0  ;;  %vm729_vm15 = vcmp.lt.s32.totalorder %v728_v52, 2 }
 0x181   :  { %v510_v45 = vmul.f32 %v509_v11, %v507_v61  ;;  %v398_v1 = vshrl.u32 %v380_v62, %v396_v63  ;;  %v401_v2 = vadd.s32 127, %v400_v0  ;;  %v317_v62 = vsel %vm93_vm1, %v1629_v49, %v313_v48 }
 0x182   :  { %v623_v63 = vadd.s32 3, %v413_v60 }
 0x183   :  { %v511_v55 = vxor.u32 2147483648, %v510_v45  ;;  %v399_v17 = vor.u32 %v398_v1, %v397_v46  ;;  %v402_v4 = vshll.u32 %v401_v2, 23  ;;  %v319_v2 = vpop.permute.xlu0 %318 }
 0x185   :  { %v512_v6 = vsel %vm429_vm6, %v511_v55, %v510_v45  ;;  %v403_v12 = vor.u32 4788187, %v402_v4  ;;  %v406_v5 = vcvt.s32.f32 %v399_v17  ;;  %v321_v45 = vpop.permute.xlu1 %320  ;;  %v417_v17 = vand.u32 3, %v413_v60 }
 0x186   :  { %v515_v7 = vsel %vm428_vm7, %v1545_v54, %v512_v6 }
 0x187   :  { %1233 = vcosq.f32 %v515_v7  ;;  %v404_v56 = vand.u32 2147483647, %v403_v12  ;;  %v323_v12 = vsel %vm93_vm1, %v321_v45, %v319_v2  ;;  %vm418_vm5 = vcmp.lt.s32.totalorder %v417_v17, 2 }
 0x188   :  { %1235 = vsinq.f32 %v515_v7  ;;  %v624_v7 = vand.u32 3, %v623_v63  ;;  %vm419_vm6 = vcmp.eq.s32.totalorder %v417_v17, 0  ;;  %vm422_vm7 = vcmp.eq.s32.totalorder %v417_v17, 2 }
 0x189   :  { %v407_v18 = vmul.f32 %v406_v5, %v404_v56 }
 0x18b   :  { %v408_v25 = vxor.u32 2147483648, %v407_v18 }
 0x18d   :  { %v409_v57 = vsel %vm326_vm8, %v408_v25, %v407_v18  ;;  %vm629_vm8 = vcmp.eq.s32.totalorder %v624_v7, 2 }
 0x18e   :  { %v412_v41 = vsel %vm325_vm9, %v1543_v53, %v409_v57  ;;  %vm626_vm9 = vcmp.eq.s32.totalorder %v624_v7, 0 }
 0x18f   :  { %1237 = vcosq.f32 %v412_v41 }
 0x190   :  { %1239 = vsinq.f32 %v412_v41 }
 0x194   :  { %v1234_v61 = vpop.eup %1233 }
 0x195   :  { %v1236_v11 = vpop.eup %1235  ;;  %v526_v10 = vxor.u32 2147483648, %v1234_v61 }
 0x196   :  { %v523_v58 = vxor.u32 2147483648, %v1236_v11 }
 0x197   :  { %v527_v3 = vsel %vm525_vm10, %v526_v10, %v1236_v11  ;;  %v735_v0 = vsel %vm733_vm11, %v526_v10, %v1236_v11  ;;  %vm625_vm10 = vcmp.lt.s32.totalorder %v624_v7, 2  ;;  %vm416_vm11 = vweird.f32 %v1543_v53 }
 0x198   :  { %v524_v46 = vsel %vm522_vm12, %v1234_v61, %v523_v58  ;;  %v732_v1 = vsel %vm730_vm13, %v1234_v61, %v523_v58 }
 0x199   :  { %v528_v55 = vsel %vm521_vm14, %v524_v46, %v527_v3  ;;  %v736_v21 = vsel %vm729_vm15, %v732_v1, %v735_v0  ;;  %v316_v0 = vsel %vm93_vm1, %v313_v48, %v1629_v49 }
 0x19a   :  { %v529_v4 = vsel %vm519_vm4, nan, %v528_v55  ;;  %v737_v6 = vsel %vm519_vm4, nan, %v736_v21  ;;  %v322_v55 = vsel %vm93_vm1, %v319_v2, %v321_v45 }
 0x19b   :  { %v739_v51 = vmul.f32 %v529_v4, %v317_v62  ;;  %v745_v56 = vmul.f32 %v737_v6, %v317_v62  ;;  %v741_v5 = vmul.f32 %v737_v6, %v323_v12  ;;  %v747_v18 = vmul.f32 %v529_v4, %v323_v12 }
 0x19c   :  { %v1238_v23 = vpop.eup %1237 }
 0x19d   :  { %v743_v25 = vsub.f32 %v739_v51, %v741_v5  ;;  %v749_v8 = vadd.f32 %v747_v18, %v745_v56  ;;  %v1240_v30 = vpop.eup %1239  ;;  %v423_v54 = vxor.u32 2147483648, %v1238_v23 }
 0x19e   :  { %v420_v57 = vxor.u32 2147483648, %v1240_v30 }
 0x19f   :  { %764 = vrot.lane.b32.xlu1 %v743_v25, %s1269_s20  ;;  %v1639_v41 = vmul.f32 %v743_v25, %v1371_v14  ;;  %v1642_v43 = vmul.f32 %v749_v8, %v1375_v16  ;;  %v757_v59 = vmul.f32 %v743_v25, %v1375_v16  ;;  %v424_v52 = vsel %vm422_vm7, %v423_v54, %v1240_v30 }
 0x1a0   :  { %v631_v60 = vsel %vm629_vm8, %v423_v54, %v1240_v30  ;;  %v759_v61 = vmul.f32 %v749_v8, %v1371_v14  ;;  %v421_v11 = vsel %vm419_vm6, %v1238_v23, %v420_v57  ;;  %v628_v10 = vsel %vm626_vm9, %v1238_v23, %v420_v57 }
 0x1a1   :  { %v755_v62 = vsub.f32 %v1639_v41, %v1642_v43  ;;  %v425_v58 = vsel %vm418_vm5, %v421_v11, %v424_v52  ;;  %v632_v63 = vsel %vm625_vm10, %v628_v10, %v631_v60 }
 0x1a2   :  { %v761_v3 = vadd.f32 %v759_v61, %v757_v59  ;;  %v426_v46 = vsel %vm416_vm11, nan, %v425_v58  ;;  %v633_v1 = vsel %vm416_vm11, nan, %v632_v63 }
 0x1a3   :  { %770 = vrot.lane.b32.xlu1 %v749_v8, %s1269_s20  ;;  %v738_v21 = vmul.f32 %v426_v46, %v316_v0  ;;  %v744_v4 = vmul.f32 %v633_v1, %v316_v0  ;;  %v740_v6 = vmul.f32 %v633_v1, %v322_v55  ;;  %v746_v7 = vmul.f32 %v426_v46, %v322_v55 }
 0x1a5   :  { %v742_v53 = vsub.f32 %v738_v21, %v740_v6  ;;  %v748_v17 = vadd.f32 %v746_v7, %v744_v4 }
 0x1a7   :  { %792 = vrot.lane.b32.xlu1 %v743_v25, %s1272_s24  ;;  %762 = vrot.lane.b32.xlu0 %v742_v53, %s1269_s20  ;;  %v752_v12 = vmul.f32 %v748_v17, %v1375_v16  ;;  %v758_v49 = vmul.f32 %v748_v17, %v1371_v14  ;;  %v750_v48 = vmul.f32 %v742_v53, %v1371_v14 }
 0x1a8   :  { %v756_v45 = vmul.f32 %v742_v53, %v1375_v16 }
 0x1a9   :  { %v754_v2 = vsub.f32 %v750_v48, %v752_v12 }
 0x1aa   :  { %v760_v51 = vadd.f32 %v758_v49, %v756_v45 }
 0x1ab   :  { %798 = vrot.lane.b32.xlu1 %v749_v8, %s1272_s24  ;;  %768 = vrot.lane.b32.xlu0 %v748_v17, %s1269_s20 }
 0x1af   :  { %820 = vrot.lane.b32.xlu1 %v743_v25, %s1273_s0  ;;  %790 = vrot.lane.b32.xlu0 %v742_v53, %s1272_s24 }
 0x1b3   :  { %826 = vrot.lane.b32.xlu1 %v749_v8, %s1273_s0  ;;  %796 = vrot.lane.b32.xlu0 %v748_v17, %s1272_s24 }
 0x1b7   :  { %848 = vrot.lane.b32.xlu1 %v743_v25, %s1275_s25  ;;  %818 = vrot.lane.b32.xlu0 %v742_v53, %s1273_s0 }
 0x1bb   :  { %854 = vrot.lane.b32.xlu1 %v749_v8, %s1275_s25  ;;  %824 = vrot.lane.b32.xlu0 %v748_v17, %s1273_s0 }
 0x1bf   :  { %846 = vrot.lane.b32.xlu0 %v742_v53, %s1275_s25 }
 0x1c3   :  { %852 = vrot.lane.b32.xlu0 %v748_v17, %s1275_s25 }
 0x211   :  { %v765_v14 = vpop.permute.xlu1 %764 }
 0x215   :  { %v771_v16 = vpop.permute.xlu1 %770 }
 0x219   :  { %v793_v56 = vpop.permute.xlu1 %792  ;;  %v763_v5 = vpop.permute.xlu0 %762 }
 0x21a   :  { %v766_v30 = vsel %vm56_vm0, %v763_v5, %v765_v14  ;;  %v767_v25 = vsel %vm56_vm0, %v765_v14, %v763_v5 }
 0x21b   :  { %v774_v57 = vmul.f32 %v766_v30, %v1369_v13  ;;  %v775_v41 = vmul.f32 %v767_v25, %v1369_v13  ;;  %v782_v52 = vmul.f32 %v766_v30, %v1373_v15  ;;  %v783_v60 = vmul.f32 %v767_v25, %v1373_v15 }
 0x21d   :  { %v799_v18 = vpop.permute.xlu1 %798  ;;  %v769_v23 = vpop.permute.xlu0 %768  ;;  %v776_v0 = vadd.f32 %v774_v57, %v754_v2  ;;  %v777_v46 = vadd.f32 %v775_v41, %v755_v62  ;;  %v784_v6 = vadd.f32 %v782_v52, %v760_v51  ;;  %v785_v7 = vadd.f32 %v783_v60, %v761_v3 }
 0x21e   :  { %v772_v43 = vsel %vm56_vm0, %v769_v23, %v771_v16  ;;  %v773_v59 = vsel %vm56_vm0, %v771_v16, %v769_v23 }
 0x21f   :  { %v778_v61 = vmul.f32 %v772_v43, %v1373_v15  ;;  %v779_v11 = vmul.f32 %v773_v59, %v1373_v15  ;;  %v786_v1 = vmul.f32 %v772_v43, %v1369_v13  ;;  %v787_v55 = vmul.f32 %v773_v59, %v1369_v13 }
 0x221   :  { %v791_v54 = vpop.permute.xlu0 %790  ;;  %v821_v8 = vpop.permute.xlu1 %820  ;;  %v780_v12 = vsub.f32 %v776_v0, %v778_v61  ;;  %v781_v49 = vsub.f32 %v777_v46, %v779_v11  ;;  %v788_v51 = vadd.f32 %v786_v1, %v784_v6  ;;  %v789_v16 = vadd.f32 %v787_v55, %v785_v7 }
 0x222   :  { %v794_v10 = vsel %vm93_vm1, %v791_v54, %v793_v56  ;;  %v795_v58 = vsel %vm93_vm1, %v793_v56, %v791_v54 }
 0x223   :  { %v802_v53 = vmul.f32 %v794_v10, %v1379_v20  ;;  %v803_v17 = vmul.f32 %v795_v58, %v1379_v20  ;;  %v810_v62 = vmul.f32 %v794_v10, %v1377_v19  ;;  %v811_v48 = vmul.f32 %v795_v58, %v1377_v19 }
 0x225   :  { %v797_v63 = vpop.permute.xlu0 %796  ;;  %v827_v15 = vpop.permute.xlu1 %826  ;;  %v805_v23 = vadd.f32 %v803_v17, %v781_v49  ;;  %v812_v54 = vadd.f32 %v810_v62, %v788_v51 }
 0x226   :  { %v800_v21 = vsel %vm93_vm1, %v797_v63, %v799_v18  ;;  %v801_v4 = vsel %vm93_vm1, %v799_v18, %v797_v63  ;;  %v804_v18 = vadd.f32 %v802_v53, %v780_v12 }
 0x227   :  { %v806_v45 = vmul.f32 %v800_v21, %v1377_v19  ;;  %v807_v2 = vmul.f32 %v801_v4, %v1377_v19  ;;  %v814_v56 = vmul.f32 %v800_v21, %v1379_v20  ;;  %v815_v5 = vmul.f32 %v801_v4, %v1379_v20 }
 0x228   :  { %v813_v19 = vadd.f32 %v811_v48, %v789_v16 }
 0x229   :  { %v819_v13 = vpop.permute.xlu0 %818  ;;  %v808_v59 = vsub.f32 %v804_v18, %v806_v45  ;;  %v809_v52 = vsub.f32 %v805_v23, %v807_v2  ;;  %v816_v61 = vadd.f32 %v814_v56, %v812_v54 }
 0x22a   :  { %v822_v14 = vsel %vm130_vm2, %v819_v13, %v821_v8  ;;  %v823_v3 = vsel %vm130_vm2, %v821_v8, %v819_v13  ;;  %v849_v8 = vpop.permute.xlu1 %848  ;;  %v817_v11 = vadd.f32 %v815_v5, %v813_v19 }
 0x22b   :  { %v830_v30 = vmul.f32 %v822_v14, %v1383_v27  ;;  %v831_v25 = vmul.f32 %v823_v3, %v1383_v27  ;;  %v838_v57 = vmul.f32 %v822_v14, %v1385_v28  ;;  %v839_v41 = vmul.f32 %v823_v3, %v1385_v28 }
 0x22d   :  { %v825_v43 = vpop.permute.xlu0 %824  ;;  %v832_v63 = vadd.f32 %v830_v30, %v808_v59  ;;  %v833_v0 = vadd.f32 %v831_v25, %v809_v52  ;;  %v840_v55 = vadd.f32 %v838_v57, %v816_v61  ;;  %v841_v21 = vadd.f32 %v839_v41, %v817_v11 }
 0x22e   :  { %v828_v60 = vsel %vm130_vm2, %v825_v43, %v827_v15  ;;  %v829_v20 = vsel %vm130_vm2, %v827_v15, %v825_v43 }
 0x22f   :  { %v834_v10 = vmul.f32 %v828_v60, %v1385_v28  ;;  %v835_v58 = vmul.f32 %v829_v20, %v1385_v28  ;;  %v842_v46 = vmul.f32 %v828_v60, %v1383_v27  ;;  %v843_v1 = vmul.f32 %v829_v20, %v1383_v27  ;;  %v855_v27 = vpop.permute.xlu1 %854 }
 0x231   :  { %v847_v4 = vpop.permute.xlu0 %846  ;;  %v836_v6 = vsub.f32 %v832_v63, %v834_v10  ;;  %v837_v7 = vsub.f32 %v833_v0, %v835_v58  ;;  %v844_v62 = vadd.f32 %v842_v46, %v840_v55  ;;  %v845_v48 = vadd.f32 %v843_v1, %v841_v21 }
 0x232   :  { %v850_v15 = vsel %vm167_vm3, %v847_v4, %v849_v8  ;;  %v851_v53 = vsel %vm167_vm3, %v849_v8, %v847_v4 }
 0x233   :  { %v858_v17 = vmul.f32 %v850_v15, %v1409_v42  ;;  %v859_v28 = vmul.f32 %v851_v53, %v1409_v42  ;;  %v866_v12 = vmul.f32 %v850_v15, %v1441_v9  ;;  %v867_v49 = vmul.f32 %v851_v53, %v1441_v9 }
 0x235   :  { %v860_v13 = vadd.f32 %v858_v17, %v836_v6  ;;  %v861_v45 = vadd.f32 %v859_v28, %v837_v7  ;;  %v853_v2 = vpop.permute.xlu0 %852  ;;  %v868_v14 = vadd.f32 %v866_v12, %v844_v62  ;;  %v869_v3 = vadd.f32 %v867_v49, %v845_v48 }
 0x236   :  { %v856_v51 = vsel %vm167_vm3, %v853_v2, %v855_v27  ;;  %v857_v16 = vsel %vm167_vm3, %v855_v27, %v853_v2 }
 0x237   :  { %v862_v56 = vmul.f32 %v856_v51, %v1441_v9  ;;  %v863_v5 = vmul.f32 %v857_v16, %v1441_v9  ;;  %v870_v18 = vmul.f32 %v856_v51, %v1409_v42  ;;  %v871_v23 = vmul.f32 %v857_v16, %v1409_v42 }
 0x239   :  { %v864_v30 = vsub.f32 %v860_v13, %v862_v56  ;;  %v865_v25 = vsub.f32 %v861_v45, %v863_v5  ;;  %v872_v54 = vadd.f32 %v870_v18, %v868_v14  ;;  %v873_v19 = vadd.f32 %v871_v23, %v869_v3 }
 0x23b   :  { %v874_v57 = vmul.f32 %v864_v30, %v864_v30  ;;  %v875_v41 = vmul.f32 %v865_v25, %v865_v25  ;;  %v876_v43 = vmul.f32 %v872_v54, %v872_v54  ;;  %v877_v8 = vmul.f32 %v873_v19, %v873_v19 }
 0x23d   :  { %v878_v59 = vadd.f32 %v876_v43, %v874_v57  ;;  %v879_v52 = vadd.f32 %v877_v8, %v875_v41 }
 0x23f   :  { %884 = vrot.lane.b32.xlu1 %v879_v52, %s1269_s20  ;;  %882 = vrot.lane.b32.xlu0 %v878_v59, %s1269_s20  ;;  %v881_v58 = vmul.f32 %v878_v59, %v1487_v31  ;;  %v880_v21 = vmul.f32 %v878_v59, %v1489_v32 }
 0x243   :  { %893 = vrot.lane.b32.xlu1 %v879_v52, %s1272_s24  ;;  %891 = vrot.lane.b32.xlu0 %v878_v59, %s1272_s24 }
 0x247   :  { %902 = vrot.lane.b32.xlu1 %v879_v52, %s1273_s0  ;;  %900 = vrot.lane.b32.xlu0 %v878_v59, %s1273_s0 }
 0x24b   :  { %911 = vrot.lane.b32.xlu1 %v879_v52, %s1275_s25  ;;  %909 = vrot.lane.b32.xlu0 %v878_v59, %s1275_s25 }
 0x24f   :  { %922 = vrot.lane.b32.xlu1 %v865_v25, %s1272_s24  ;;  %920 = vrot.lane.b32.xlu0 %v864_v30, %s1272_s24 }
 0x253   :  { %927 = vrot.lane.b32.xlu1 %v873_v19, %s1272_s24  ;;  %925 = vrot.lane.b32.xlu0 %v872_v54, %s1272_s24 }
 0x2b1   :  { %v885_v42 = vpop.permute.xlu1 %884  ;;  %v883_v9 = vpop.permute.xlu0 %882 }
 0x2b2   :  { %v886_v60 = vsel %vm56_vm0, %v883_v9, %v885_v42 }
 0x2b3   :  { %v889_v10 = vmul.f32 %v886_v60, %v1493_v34  ;;  %v887_v63 = vmul.f32 %v886_v60, %v1491_v33 }
 0x2b5   :  { %v894_v20 = vpop.permute.xlu1 %893  ;;  %v892_v61 = vpop.permute.xlu0 %891  ;;  %v890_v4 = vadd.f32 %v889_v10, %v881_v58  ;;  %v888_v15 = vadd.f32 %v887_v63, %v880_v21 }
 0x2b6   :  { %v895_v11 = vsel %vm93_vm1, %v892_v61, %v894_v20 }
 0x2b7   :  { %v898_v0 = vmul.f32 %v895_v11, %v1497_v36  ;;  %v896_v6 = vmul.f32 %v895_v11, %v1501_v38 }
 0x2b9   :  { %v903_v46 = vpop.permute.xlu1 %902  ;;  %v901_v1 = vpop.permute.xlu0 %900  ;;  %v899_v34 = vadd.f32 %v898_v0, %v890_v4  ;;  %v897_v17 = vadd.f32 %v896_v6, %v888_v15 }
 0x2ba   :  { %v904_v55 = vsel %vm130_vm2, %v901_v1, %v903_v46 }
 0x2bb   :  { %v907_v7 = vmul.f32 %v904_v55, %v1495_v35  ;;  %v905_v31 = vmul.f32 %v904_v55, %v1505_v40 }
 0x2bd   :  { %v912_v53 = vpop.permute.xlu1 %911  ;;  %v910_v33 = vpop.permute.xlu0 %909  ;;  %v908_v28 = vadd.f32 %v907_v7, %v899_v34  ;;  %v906_v49 = vadd.f32 %v905_v31, %v897_v17 }
 0x2be   :  { %v913_v36 = vsel %vm167_vm3, %v910_v33, %v912_v53 }
 0x2bf   :  { %v914_v12 = vmul.f32 %v913_v36, %v1503_v39  ;;  %v916_v32 = vmul.f32 %v913_v36, %v1499_v37 }
 0x2c1   :  { %v917_v27 = vadd.f32 %v916_v32, %v908_v28  ;;  %v915_v38 = vadd.f32 %v914_v12, %v906_v49 }
 0x2c3   :  { %v918_v62 = vrot.slane %v917_v27, 4 }
 0x2c5   :  { %v1768_v35 = vadd.f32 %v918_v62, %v915_v38 }
 0x2c7   :  { %v933_v48 = vand.u32 2139095040, %v1768_v35  ;;  %v930_v2 = vand.u32 2147483647, %v1768_v35  ;;  %vm932_vm4 = vcmp.lt.s32.totalorder %v1768_v35, 0 }
 0x2c9   :  { %v934_v40 = vshrl.u32 %v933_v48, 23  ;;  %v937_v37 = vand.u32 8388607, %v930_v2  ;;  %vm931_vm5 = vcmp.le.f32.partialorder %v930_v2, 0.7853982 }
 0x2cb   :  { %v1179_v13 = vadd.s32 4294967169, %v934_v40  ;;  %v938_v41 = vor.u32 8388608, %v937_v37 }
 0x2cd   :  { %v940_v45 = vadd.s32 1, %v1179_v13 }
 0x2cf   :  { %vm941_vm0 = vcmp.gt.s32.totalorder %v940_v45, 0 }
 0x2d0   :  { %v942_v14 = vsel %vm941_vm0, %v940_v45, 0  ;;  %vm1022_vm0 = vweird.f32 %v1768_v35 }
 0x2d1   :  { %v944_v3 = vand.u32 31, %v942_v14  ;;  %v943_v39 = vshrl.u32 %v942_v14, 5 }
 0x2d3   :  { %v945_v51 = vsub.s32 32, %v944_v3  ;;  %v947_v16 = vshll.u32 %v1276_v22, %v944_v3  ;;  %v950_v56 = vshll.u32 %v1277_v24, %v944_v3  ;;  %v953_v23 = vshll.u32 %v1278_v29, %v944_v3 }
 0x2d4   :  { %v956_v25 = vshll.u32 %v1279_v44, %v944_v3  ;;  %v959_v19 = vshll.u32 %v1280_v47, %v944_v3  ;;  %vm962_vm2 = vcmp.lt.s32.totalorder %v943_v39, 1  ;;  %vm965_vm3 = vcmp.lt.s32.totalorder %v943_v39, 4 }
 0x2d5   :  { %v948_v5 = vshrl.u32 %v1277_v24, %v945_v51  ;;  %v951_v18 = vshrl.u32 %v1278_v29, %v945_v51  ;;  %v954_v30 = vshrl.u32 %v1279_v44, %v945_v51  ;;  %v957_v54 = vshrl.u32 %v1280_v47, %v945_v51 }
 0x2d6   :  { %v960_v57 = vshrl.u32 %v1281_v50, %v945_v51  ;;  %v946_v60 = vshrl.u32 %v1276_v22, %v945_v51  ;;  %vm964_vm12 = vcmp.lt.s32.totalorder %v943_v39, 3  ;;  %vm963_vm13 = vcmp.lt.s32.totalorder %v943_v39, 2 }
 0x2d7   :  { %v949_v43 = vor.u32 %v948_v5, %v947_v16  ;;  %v952_v8 = vor.u32 %v951_v18, %v950_v56  ;;  %v955_v59 = vor.u32 %v954_v30, %v953_v23  ;;  %v958_v52 = vor.u32 %v957_v54, %v956_v25  ;;  %v923_v30 = vpop.permute.xlu1 %922  ;;  %v921_v25 = vpop.permute.xlu0 %920 }
 0x2d8   :  { %v961_v24 = vor.u32 %v960_v57, %v959_v19  ;;  %v978_v50 = vshll.u32 %v938_v41, 8 }
 0x2d9   :  { %v967_v42 = vsel %vm965_vm3, %v955_v59, 2102212464  ;;  %v970_v29 = vsel %vm962_vm2, %v949_v43, %v952_v8  ;;  %v974_v9 = vsel %vm962_vm2, %v952_v8, %v955_v59  ;;  %v971_v44 = vsel %vm965_vm3, %v958_v52, 920167782 }
 0x2da   :  { %v975_v20 = vsel %vm965_vm3, %v961_v24, 1326507024  ;;  %v972_v47 = vsel %vm964_vm12, %v955_v59, %v971_v44  ;;  %v966_v11 = vsel %vm962_vm2, %v946_v60, %v949_v43  ;;  %v968_v10 = vsel %vm964_vm12, %v952_v8, %v967_v42 }
 0x2db   :  { %v976_v61 = vsel %vm964_vm12, %v958_v52, %v975_v20  ;;  %v973_v58 = vsel %vm963_vm13, %v970_v29, %v972_v47  ;;  %v969_v21 = vsel %vm963_vm13, %v966_v11, %v968_v10  ;;  %v928_v52 = vpop.permute.xlu1 %927  ;;  %v926_v24 = vpop.permute.xlu0 %925  ;;  %v924_v44 = vsel %vm93_vm1, %v921_v25, %v923_v30 }
 0x2dc   :  { %v977_v63 = vsel %vm963_vm13, %v974_v9, %v976_v61  ;;  %v1788_v1 = vmul.u32.u64.low %v978_v50, %v973_v58  ;;  %v1789_v55 = vmul.u32.u64.high %v978_v50, %v973_v58, %v1788_v1  ;;  %v985_v4 = vmul.u32 %v978_v50, %v969_v21 }
 0x2dd   :  { %v1785_v0 = vmul.u32.u64.low %v978_v50, %v977_v63  ;;  %v1786_v46 = vmul.u32.u64.high %v978_v50, %v977_v63, %v1785_v0  ;;  %v929_v61 = vsel %vm93_vm1, %v926_v24, %v928_v52 }
 0x2de   :  { %v988_v22 = vadd.s32 1, %v1789_v55 }
 0x2df   :  { %vm987_vm14 = vc.u32 %v1786_v46, %v1788_v1  ;;  %v986_v32 = vadd.s32 %v1788_v1, %v1786_v46 }
 0x2e0   :  { %v989_v6 = vsel %vm987_vm14, %v988_v22, %v1789_v55 }
 0x2e1   :  { %v990_v7 = vadd.s32 %v989_v6, %v985_v4 }
 0x2e3   :  { %v991_v15 = vadd.s32 536870912, %v990_v7 }
 0x2e5   :  { %v992_v34 = vshrl.u32 %v991_v15, 30 }
 0x2e7   :  { %v993_v31 = vshll.u32 %v992_v34, 30  ;;  %v1016_v39 = vsub.s32 4, %v992_v34 }
 0x2e9   :  { %v994_v53 = vsub.s32 %v990_v7, %v993_v31  ;;  %v1017_v5 = vsel %vm932_vm4, %v1016_v39, %v992_v34 }
 0x2ea   :  { %v1019_v18 = vsel %vm931_vm5, 0, %v1017_v5 }
 0x2eb   :  { %v996_v33 = vsub.s32 0, %v994_v53  ;;  %v1126_v23 = vadd.s32 3, %v1019_v18  ;;  %v1023_v54 = vand.u32 3, %v1019_v18 }
 0x2ed   :  { %v1180_v36 = vmin.u32 %v996_v33, %v994_v53  ;;  %v1127_v19 = vand.u32 3, %v1126_v23  ;;  %vm1028_vm6 = vcmp.eq.s32.totalorder %v1023_v54, 2  ;;  %vm1025_vm8 = vcmp.eq.s32.totalorder %v1023_v54, 0 }
 0x2ee   :  { %vm1024_vm10 = vcmp.lt.s32.totalorder %v1023_v54, 2 }
 0x2ef   :  { %v998_v17 = vclz %v1180_v36  ;;  %vm1132_vm7 = vcmp.eq.s32.totalorder %v1127_v19, 2  ;;  %vm1129_vm9 = vcmp.eq.s32.totalorder %v1127_v19, 0  ;;  %vm1128_vm11 = vcmp.lt.s32.totalorder %v1127_v19, 2 }
 0x2f1   :  { %v1181_v28 = vadd.s32 4294967294, %v998_v17 }
 0x2f3   :  { %vm1182_vm15 = vcmp.lt.s32.totalorder %v1181_v28, 0 }
 0x2f4   :  { %v1001_v12 = vsel %vm1182_vm15, 0, %v1181_v28 }
 0x2f5   :  { %v1002_v49 = vsub.s32 32, %v1001_v12  ;;  %v1006_v27 = vsub.s32 4294967266, %v1001_v12  ;;  %v1003_v38 = vshll.u32 %v994_v53, %v1001_v12 }
 0x2f7   :  { %v1004_v62 = vshrl.u32 %v986_v32, %v1002_v49  ;;  %v1007_v48 = vadd.s32 127, %v1006_v27 }
 0x2f9   :  { %v1005_v40 = vor.u32 %v1004_v62, %v1003_v38  ;;  %v1008_v13 = vshll.u32 %v1007_v48, 23 }
 0x2fb   :  { %v1009_v45 = vor.u32 4788187, %v1008_v13  ;;  %v1012_v3 = vcvt.s32.f32 %v1005_v40 }
 0x2fd   :  { %v1010_v14 = vand.u32 2147483647, %v1009_v45 }
 0x2ff   :  { %v1013_v51 = vmul.f32 %v1012_v3, %v1010_v14 }
 0x301   :  { %v1014_v37 = vxor.u32 2147483648, %v1013_v51 }
 0x303   :  { %v1015_v16 = vsel %vm932_vm4, %v1014_v37, %v1013_v51 }
 0x304   :  { %v1018_v56 = vsel %vm931_vm5, %v1768_v35, %v1015_v16 }
 0x305   :  { %1241 = vcosq.f32 %v1018_v56 }
 0x306   :  { %1243 = vsinq.f32 %v1018_v56 }
 0x312   :  { %v1242_v57 = vpop.eup %1241 }
 0x313   :  { %v1244_v41 = vpop.eup %1243  ;;  %v1029_v43 = vxor.u32 2147483648, %v1242_v57 }
 0x314   :  { %v1026_v8 = vxor.u32 2147483648, %v1244_v41 }
 0x315   :  { %v1030_v2 = vsel %vm1028_vm6, %v1029_v43, %v1244_v41  ;;  %v1134_v59 = vsel %vm1132_vm7, %v1029_v43, %v1244_v41 }
 0x316   :  { %v1027_v42 = vsel %vm1025_vm8, %v1242_v57, %v1026_v8  ;;  %v1131_v29 = vsel %vm1129_vm9, %v1242_v57, %v1026_v8 }
 0x317   :  { %v1031_v9 = vsel %vm1024_vm10, %v1027_v42, %v1030_v2  ;;  %v1135_v60 = vsel %vm1128_vm11, %v1131_v29, %v1134_v59 }
 0x318   :  { %v1032_v20 = vsel %vm1022_vm0, nan, %v1031_v9  ;;  %v1136_v47 = vsel %vm1022_vm0, nan, %v1135_v60 }
 0x319   :  { %v1137_v50 = vmul.f32 %v1032_v20, %v924_v44  ;;  %v1140_v11 = vmul.f32 %v1136_v47, %v924_v44  ;;  %v1138_v10 = vmul.f32 %v1136_v47, %v929_v61  ;;  %v1141_v58 = vmul.f32 %v1032_v20, %v929_v61 }
 0x31b   :  { %v1139_v63 = vsub.f32 %v1137_v50, %v1138_v10  ;;  %v1142_v0 = vadd.f32 %v1141_v58, %v1140_v11 }
 0x31d   :  { %1143 = vst [vmem:[#allocation2] sm:$0xff] %v1139_v63  ;;  %1144 = vst [vmem:[#allocation2 + $0x8] sm:$0xff] %v1142_v0 }
 0x31e   :  { %1256 = shalt.err (!%p1253_p4)
}
 0x31f   :  { %s1283_s5 = smov 128   ;;  %s1284_s6 = smov 8  }
 0x320   :  { %1156 = dma.vmem_to_hbm [thread:$0]  %s1151_s30, 256, %s1810_s3, [#allocation3], %s1283_s5, %s1283_s5, %s1284_s6  }
 0x321   :  { %1265 = dma.done.wait [#allocation3], 256  }
 0x322   :  { %1266 = vsyncadd [#allocation3], 4294967040 }
 0x323   :  { %1160 = vsyncpa [#allocation3], 1 }

</bundles_post_ra>
